<compile_context>
chip_gen: v7x
topology: tpu7x:2x2x1
jax: 0.10.0
libtpu: 0.0.40
codegen_flags: <defaults>
</compile_context>

<pallas_src>
import functools

import jax
import jax.numpy as jnp
from jax.experimental import pallas as pl
from jax.experimental.pallas import tpu as pltpu

LEAKY_SLOPE = 0.01   # default negative_slope of nn.LeakyReLU / F.leaky_relu
CPAD = 128           # output-channel padding -> lane-dense (128-wide) layouts


def _round_up(x, m):
    return (x + m - 1) // m * m


def _mosaic_params():
    return pltpu.CompilerParams(
        dimension_semantics=("parallel",),          # batch axis -> both TCs on v7x
        vmem_limit_bytes=32 * 1024 * 1024)          # well under v7x's 64 MiB


# ----------------------------------------------------------------------------
# XLA-side patch packing (partial im2col on narrow-channel data, K packed)
# ----------------------------------------------------------------------------
def _pack_patches(x_nhwc, kh, kw, stride, pad):
    """x_nhwc: (B, H, W, C) with the *real* channel count C.

    Returns (patches, Ho, Wo) with patches : (B, kh, Ho*Wo, Kp) bf16 where
      patches[b, i, oh*Wo + ow, j*C + c] = xpad[b, stride*oh + i, stride*ow + j, c]
    and Kp = round_up(kw*C, 128) (zeros in the lane pad).  The conv kernel then only
    does `out += patches[i] @ w[i]` for i in range(kh): K is packed to 128 lanes and
    stride is folded into the packing (no compute-and-discard).
    """
    B, H, W, C = x_nhwc.shape
    xp = x_nhwc if pad == 0 else jnp.pad(
        x_nhwc, ((0, 0), (pad, pad), (pad, pad), (0, 0)))
    Hp, Wp = H + 2 * pad, W + 2 * pad
    Ho = (Hp - kh) // stride + 1
    Wo = (Wp - kw) // stride + 1
    Kp = _round_up(kw * C, 128)
    rows = []
    for i in range(kh):
        taps = [xp[:, i:i + (Ho - 1) * stride + 1:stride,
                   j:j + (Wo - 1) * stride + 1:stride, :] for j in range(kw)]
        rows.append(jnp.concatenate(taps, axis=-1).reshape(B, 1, Ho * Wo, kw * C))
    p = jnp.concatenate(rows, axis=1)                         # (B, kh, Ho*Wo, kw*C)
    p = jnp.pad(p, ((0, 0), (0, 0), (0, 0), (0, Kp - kw * C)))
    return p.astype(jnp.bfloat16), Ho, Wo


# ----------------------------------------------------------------------------
# Pallas kernels
# ----------------------------------------------------------------------------
def _conv0_kernel(p_ref, w_ref, b_ref, o_ref, *, kh, ho, wo):
    """conv0 (7x7, s1, p1) + bias + LeakyReLU + fused 2x2 max-pool, one batch elem.

    p_ref: (kh, ho*wo, Kp) bf16    packed patches (K packed to 128)
    w_ref: (kh, Kp, CPAD)  bf16
    b_ref: (1, CPAD)       f32
    o_ref: ((ho//2)*(wo//2), CPAD) bf16   pooled output, flat spatial
    """
    acc = jnp.dot(p_ref[0], w_ref[0], preferred_element_type=jnp.float32)
    for i in range(1, kh):
        acc = acc + jnp.dot(p_ref[i], w_ref[i], preferred_element_type=jnp.float32)
    acc = acc + b_ref[...]                                  # bias added once
    acc = jnp.maximum(acc, LEAKY_SLOPE * acc)               # LeakyReLU

    # 2x2 max-pool (stride 2): reshape + max, then one lane-dense store.
    y = acc.reshape(ho // 2, 2, wo, CPAD)
    y = jnp.maximum(y[:, 0], y[:, 1])                       # (ho//2, wo, CPAD)
    y = y.reshape(ho // 2, wo // 2, 2, CPAD)
    y = jnp.max(y, axis=2)                                  # (ho//2, wo//2, CPAD)
    o_ref[...] = y.reshape((ho // 2) * (wo // 2), CPAD).astype(o_ref.dtype)


def _resblock_kernel(*refs, h_out, w_out, downsample, head):
    """Fully fused ResBlock for one batch element.

    refs = p1, w1, b1, w2, b2, res, [wsc, bsc], [fcw, fcb], out
      p1 : (3, M, Kp)        bf16  packed conv1 patches (stride already applied)
      w1 : (3, Kp, CPAD)     bf16
      b1 : (1, CPAD)         f32
      w2 : (3, 3*CPAD, CPAD) bf16  conv2 weights in lane-concat layout
      b2 : (1, CPAD)         f32
      res: (M, CPAD)         bf16  identity residual, or shortcut *input* (subsampled)
      wsc: (CPAD, CPAD) bf16, bsc: (1, CPAD) f32   (only when downsample)
      fcw: (1, CPAD) f32,     fcb: (1, 1) f32      (only for the fused head)
      out: (M, CPAD) bf16, or (1, CPAD) f32 for the head
    """
    it = iter(refs)
    p1_ref, w1_ref, b1_ref, w2_ref, b2_ref, res_ref = (next(it) for _ in range(6))
    wsc_ref = next(it) if downsample else None
    bsc_ref = next(it) if downsample else None
    fcw_ref = next(it) if head else None
    fcb_ref = next(it) if head else None
    o_ref = next(it)

    m = h_out * w_out

    # ---- conv1 (stride folded into the packed patches) + bias + LeakyReLU ----
    acc1 = jnp.dot(p1_ref[0], w1_ref[0], preferred_element_type=jnp.float32)
    for i in range(1, 3):
        acc1 = acc1 + jnp.dot(p1_ref[i], w1_ref[i],
                              preferred_element_type=jnp.float32)
    acc1 = acc1 + b1_ref[...]
    acc1 = jnp.maximum(acc1, LEAKY_SLOPE * acc1)            # (m, CPAD) f32, in VMEM

    # ---- conv2 (3x3, s1, p1) on the VMEM-resident conv1 output ----
    # Spatial zero-pad via concats, lane-concat the 3 (128-aligned) column shifts,
    # then one fat (m, 3*CPAD) x (3*CPAD, CPAD) dot per kernel row.
    # TODO(synk): conv2's K is still 128-padded (8-16x zero FLOPs); packing it would
    #             need sub-128-lane shuffles of the in-VMEM activation -- not worth it
    #             at these sizes.
    y = acc1.reshape(h_out, w_out, CPAD)
    zr = jnp.zeros((1, w_out, CPAD), jnp.float32)
    y = jnp.concatenate([zr, y, zr], axis=0)                # (h+2, w, CPAD)
    zc = jnp.zeros((h_out + 2, 1, CPAD), jnp.float32)
    y = jnp.concatenate([zc, y, zc], axis=1)                # (h+2, w+2, CPAD)
    cols = jnp.concatenate([y[:, j:j + w_out, :] for j in range(3)], axis=2)
    acc2 = None
    for i in range(3):
        patch = cols[i:i + h_out].reshape(m, 3 * CPAD).astype(jnp.bfloat16)
        d = jnp.dot(patch, w2_ref[i], preferred_element_type=jnp.float32)
        acc2 = d if acc2 is None else acc2 + d
    acc2 = acc2 + b2_ref[...]

    # ---- residual: identity, or fused 1x1 strided shortcut ----
    if downsample:
        r = jnp.dot(res_ref[...], wsc_ref[...],
                    preferred_element_type=jnp.float32) + bsc_ref[...]
    else:
        r = res_ref[...].astype(jnp.float32)
    out = acc2 + r
    out = jnp.maximum(out, LEAKY_SLOPE * out)               # final LeakyReLU

    if head:
        # Fused global max pool (full spatial extent) + fc(1).  Padded channels are
        # exactly zero in both `out` and fcw, so the result is exact.
        g = jnp.max(out, axis=0, keepdims=True)             # (1, CPAD)
        yfc = jnp.sum(g * fcw_ref[...], axis=-1, keepdims=True) + fcb_ref[...]
        o_ref[...] = jnp.broadcast_to(yfc, o_ref.shape)
    else:
        o_ref[...] = out.astype(o_ref.dtype)


# ----------------------------------------------------------------------------
# pallas_call wrappers
# ----------------------------------------------------------------------------
def conv0_forward(x_nhwc, p):
    """x_nhwc: (B, H, W, Cin) f32.  Returns (flat (B, Hp*Wp, CPAD) bf16, Hp, Wp)."""
    B = x_nhwc.shape[0]
    patches, ho, wo = _pack_patches(x_nhwc, kh=7, kw=7, stride=1, pad=1)
    assert ho % 2 == 0 and wo % 2 == 0, "2x2 max-pool needs even conv0 output dims"
    m = ho * wo
    kp = patches.shape[-1]

    kernel = functools.partial(_conv0_kernel, kh=7, ho=ho, wo=wo)
    flops = 2 * B * m * kp * CPAD * 7
    bytes_accessed = (patches.size * 2 + p["w"].size * 2 + p["b"].size * 4 +
                      B * (m // 4) * CPAD * 2)
    out = pl.pallas_call(
        kernel,
        grid=(B,),
        in_specs=[
            pl.BlockSpec((None, 7, m, kp), lambda b: (b, 0, 0, 0)),
            pl.BlockSpec((7, kp, CPAD), lambda b: (0, 0, 0)),
            pl.BlockSpec((1, CPAD), lambda b: (0, 0)),
        ],
        out_specs=pl.BlockSpec((None, m // 4, CPAD), lambda b: (b, 0, 0)),
        out_shape=jax.ShapeDtypeStruct((B, m // 4, CPAD), jnp.bfloat16),
        compiler_params=_mosaic_params(),
        cost_estimate=pl.CostEstimate(flops=int(flops), transcendentals=0,
                                      bytes_accessed=int(bytes_accessed)),
    )(patches, p["w"], p["b"])
    return out, ho // 2, wo // 2


def resblock_forward(x_flat, h, w, p, head=None):
    """One fused ResBlock.  x_flat: (B, h*w, CPAD) bf16 (lanes >= cin are zero)."""
    B = x_flat.shape[0]
    cin, ds = p["cin"], p["downsample"]
    x_nhwc = x_flat.reshape(B, h, w, CPAD)[..., :cin]
    patches, h2, w2 = _pack_patches(x_nhwc, kh=3, kw=3, stride=ds, pad=1)
    m = h2 * w2
    kp = patches.shape[-1]

    if ds > 1:  # shortcut input: exact 1x1-stride-s sampling, already 128-lane padded
        res = x_flat.reshape(B, h, w, CPAD)[:, ::ds, ::ds, :].reshape(B, m, CPAD)
    else:       # identity residual
        res = x_flat

    c1, c2, sc = p["conv1"], p["conv2"], p["shortcut"]
    inputs = [patches, c1["w"], c1["b"], c2["w"], c2["b"], res]
    in_specs = [
        pl.BlockSpec((None, 3, m, kp), lambda b: (b, 0, 0, 0)),
        pl.BlockSpec((3, kp, CPAD), lambda b: (0, 0, 0)),
        pl.BlockSpec((1, CPAD), lambda b: (0, 0)),
        pl.BlockSpec((3, 3 * CPAD, CPAD), lambda b: (0, 0, 0)),
        pl.BlockSpec((1, CPAD), lambda b: (0, 0)),
        pl.BlockSpec((None, m, CPAD), lambda b: (b, 0, 0)),
    ]
    if ds > 1:
        inputs += [sc["w"], sc["b"]]
        in_specs += [pl.BlockSpec((CPAD, CPAD), lambda b: (0, 0)),
                     pl.BlockSpec((1, CPAD), lambda b: (0, 0))]
    if head is not None:
        fcw, fcb = head
        inputs += [fcw, fcb]
        in_specs += [pl.BlockSpec((1, CPAD), lambda b: (0, 0)),
                     pl.BlockSpec((1, 1), lambda b: (0, 0))]

    if head is not None:
        out_shape = jax.ShapeDtypeStruct((B, 1, CPAD), jnp.float32)
        out_spec = pl.BlockSpec((None, 1, CPAD), lambda b: (b, 0, 0))
        out_bytes = B * CPAD * 4
    else:
        out_shape = jax.ShapeDtypeStruct((B, m, CPAD), jnp.bfloat16)
        out_spec = pl.BlockSpec((None, m, CPAD), lambda b: (b, 0, 0))
        out_bytes = B * m * CPAD * 2

    kernel = functools.partial(_resblock_kernel, h_out=h2, w_out=w2,
                               downsample=ds > 1, head=head is not None)
    flops = 2 * B * m * CPAD * (3 * kp + 3 * 3 * CPAD + (CPAD if ds > 1 else 0))
    bytes_accessed = (patches.size * 2 + c1["w"].size * 2 + c2["w"].size * 2 +
                      res.size * 2 + 2 * CPAD * 4 + out_bytes)
    out = pl.pallas_call(
        kernel,
        grid=(B,),
        in_specs=in_specs,
        out_specs=out_spec,
        out_shape=out_shape,
        compiler_params=_mosaic_params(),
        cost_estimate=pl.CostEstimate(flops=int(flops), transcendentals=0,
                                      bytes_accessed=int(bytes_accessed)),
    )(*inputs)
    return out, h2, w2


# ----------------------------------------------------------------------------
# Parameter init (deterministic, PyTorch-default-like bounds) + packing
# ----------------------------------------------------------------------------
def _init_conv_raw(key, cout, cin, kh, kw):
    k1, k2 = jax.random.split(key)
    bound = 1.0 / ((cin * kh * kw) ** 0.5)
    w = jax.random.uniform(k1, (cout, cin, kh, kw), jnp.float32, -bound, bound)
    b = jax.random.uniform(k2, (cout,), jnp.float32, -bound, bound)
    return w, b


def _pad_bias(b):
    return jnp.pad(b, (0, CPAD - b.shape[0])).reshape(1, CPAD).astype(jnp.float32)


def _pack_w_kgroup(w):
    """(Cout,Cin,KH,KW) -> (KH, round_up(KW*Cin,128), CPAD) bf16, taps packed in K."""
    cout, cin, kh, kw = w.shape
    assert cout <= CPAD
    kp = _round_up(kw * cin, 128)
    wt = jnp.transpose(w, (2, 3, 1, 0)).reshape(kh, kw * cin, cout)
    wt = jnp.pad(wt, ((0, 0), (0, kp - kw * cin), (0, CPAD - cout)))
    return wt.astype(jnp.bfloat16)


def _pack_w_wide(w):
    """(Cout,Cin,3,3) -> (3, 3*CPAD, CPAD) bf16 (per-tap channels padded to 128)."""
    cout, cin, kh, kw = w.shape
    assert cin <= CPAD and cout <= CPAD
    wt = jnp.transpose(w, (2, 3, 1, 0))
    wt = jnp.pad(wt, ((0, 0), (0, 0), (0, CPAD - cin), (0, CPAD - cout)))
    return wt.reshape(kh, kw * CPAD, CPAD).astype(jnp.bfloat16)


def _pack_w_1x1(w):
    cout, cin, _, _ = w.shape
    assert cin <= CPAD and cout <= CPAD
    wt = jnp.transpose(w, (1, 0, 2, 3))[:, :, 0, 0]          # (cin, cout)
    wt = jnp.pad(wt, ((0, CPAD - cin), (0, CPAD - cout)))
    return wt.astype(jnp.bfloat16)


def _init_resblock(key, cin, cout):
    k1, k2, k3 = jax.random.split(key, 3)
    w1, b1 = _init_conv_raw(k1, cout, cin, 3, 3)
    w2, b2 = _init_conv_raw(k2, cout, cout, 3, 3)
    ws, bs = _init_conv_raw(k3, cout, cin, 1, 1)
    return {
        "downsample": cout // cin, "cin": cin, "cout": cout,
        "conv1": {"w": _pack_w_kgroup(w1), "b": _pad_bias(b1)},
        "conv2": {"w": _pack_w_wide(w2), "b": _pad_bias(b2)},
        "shortcut": {"w": _pack_w_1x1(ws), "b": _pad_bias(bs)},
    }


def init_resnet_params(key, in_channels, nblocks, fmaps):
    keys = jax.random.split(key, 3 + 2 * nblocks)
    ki = 0
    params = {}
    w0, b0 = _init_conv_raw(keys[ki], fmaps[0], in_channels, 7, 7); ki += 1
    params["conv0"] = {"w": _pack_w_kgroup(w0), "b": _pad_bias(b0)}
    params["layer1"] = [_init_resblock(keys[ki + i], fmaps[0], fmaps[0])
                        for i in range(nblocks)]; ki += nblocks
    params["layer2"] = [_init_resblock(keys[ki], fmaps[0], fmaps[1])]; ki += 1
    params["layer3"] = [_init_resblock(keys[ki + i], fmaps[1], fmaps[1])
                        for i in range(nblocks)]; ki += nblocks
    kfc1, kfc2 = jax.random.split(keys[ki])
    bound = 1.0 / (fmaps[1] ** 0.5)
    fcw = jax.random.uniform(kfc1, (1, fmaps[1]), jnp.float32, -bound, bound)
    fcb = jax.random.uniform(kfc2, (1,), jnp.float32, -bound, bound)
    params["fc_w"] = jnp.pad(fcw, ((0, 0), (0, CPAD - fmaps[1]))).astype(jnp.float32)
    params["fc_b"] = fcb.reshape(1, 1).astype(jnp.float32)
    return params


# ----------------------------------------------------------------------------
# Forward
# ----------------------------------------------------------------------------
def resnet_forward(x_nchw, params):
    x = jnp.transpose(x_nchw, (0, 2, 3, 1))                  # one NCHW->NHWC only
    x, h, w = conv0_forward(x, params["conv0"])              # conv0+leaky+pool fused
    for bp in params["layer1"]:
        x, h, w = resblock_forward(x, h, w, bp)
    for bp in params["layer2"]:
        x, h, w = resblock_forward(x, h, w, bp)
    # TODO(synk): nn.Dropout(0.3) (after layer2 and before fc) is an inference-mode identity.
    blocks3 = params["layer3"]
    for bp in blocks3[:-1]:
        x, h, w = resblock_forward(x, h, w, bp)
    # Last block: fused global-max-pool + fc head, output (B, 1, CPAD) f32.
    y, _, _ = resblock_forward(x, h, w, blocks3[-1],
                               head=(params["fc_w"], params["fc_b"]))
    return y[:, 0, 0:1]                                      # (B, 1) float32


if __name__ == "__main__":
    key = jax.random.PRNGKey(0)
    k_param, k_x = jax.random.split(key)

    in_channels, nblocks, fmaps = 4, 1, [8, 16]
    params = init_resnet_params(k_param, in_channels, nblocks, fmaps)

    x = jax.random.normal(k_x, (2, in_channels, 16, 16), jnp.float32)  # NCHW like PyTorch

    y = resnet_forward(x, params)
    jax.block_until_ready(y)
    assert y.shape == (2, 1), y.shape
    assert bool(jnp.all(jnp.isfinite(y)))
    print("KERNEL_OK")
</pallas_src>

<mosaic_0001>
module attributes {stable_mosaic.version = 11 : i64} {
  func.func @_conv0_kernel(%arg0: i32, %arg1: memref<1x7x144x128xbf16, #tpu.memory_space<vmem>>, %arg2: memref<7x128x128xbf16, #tpu.memory_space<vmem>>, %arg3: memref<1x128xf32, #tpu.memory_space<vmem>>, %arg4: memref<1x36x128xbf16, #tpu.memory_space<vmem>>) attributes {dimension_semantics = [#tpu.dimension_semantics<parallel>], iteration_bounds = array<i64: 2>, scalar_prefetch = 0 : i64, scratch_operands = 0 : i64, tpu.core_type = #tpu.core_type<tc>, window_params = [{transform_indices = @transform_0, window_bounds = array<i64: 1, 7, 144, 128>}, {pipeline_mode = #tpu.pipeline_mode<synchronous>, transform_indices = @transform_1, window_bounds = array<i64: 7, 128, 128>}, {pipeline_mode = #tpu.pipeline_mode<synchronous>, transform_indices = @transform_2, window_bounds = array<i64: 1, 128>}, {transform_indices = @transform_3, window_bounds = array<i64: 1, 36, 128>}]} {
    %c0 = arith.constant 0 : index
    %c0_0 = arith.constant 0 : index
    %c0_1 = arith.constant 0 : index
    %c0_2 = arith.constant 0 : index
    %0 = vector.load %arg1[%c0, %c0_0, %c0_1, %c0_2] : memref<1x7x144x128xbf16, #tpu.memory_space<vmem>>, vector<1x1x144x128xbf16>
    %1 = vector.shape_cast %0 : vector<1x1x144x128xbf16> to vector<144x128xbf16>
    %c0_3 = arith.constant 0 : index
    %c0_4 = arith.constant 0 : index
    %c0_5 = arith.constant 0 : index
    %2 = vector.load %arg2[%c0_3, %c0_4, %c0_5] : memref<7x128x128xbf16, #tpu.memory_space<vmem>>, vector<1x128x128xbf16>
    %3 = vector.shape_cast %2 : vector<1x128x128xbf16> to vector<128x128xbf16>
    %cst = arith.constant dense<0.000000e+00> : vector<144x128xf32>
    %4 = tpu.matmul %1, %3, %cst {dimension_numbers = #tpu.dot_dimension_numbers<[1], [0], [0], [1], [0, 0, 1, 1], [], []>} : vector<144x128xbf16>, vector<128x128xbf16>, vector<144x128xf32> -> vector<144x128xf32>
    %c0_6 = arith.constant 0 : index
    %c1 = arith.constant 1 : index
    %c0_7 = arith.constant 0 : index
    %c0_8 = arith.constant 0 : index
    %5 = vector.load %arg1[%c0_6, %c1, %c0_7, %c0_8] : memref<1x7x144x128xbf16, #tpu.memory_space<vmem>>, vector<1x1x144x128xbf16>
    %6 = vector.shape_cast %5 : vector<1x1x144x128xbf16> to vector<144x128xbf16>
    %c1_9 = arith.constant 1 : index
    %c0_10 = arith.constant 0 : index
    %c0_11 = arith.constant 0 : index
    %7 = vector.load %arg2[%c1_9, %c0_10, %c0_11] : memref<7x128x128xbf16, #tpu.memory_space<vmem>>, vector<1x128x128xbf16>
    %8 = vector.shape_cast %7 : vector<1x128x128xbf16> to vector<128x128xbf16>
    %cst_12 = arith.constant dense<0.000000e+00> : vector<144x128xf32>
    %9 = tpu.matmul %6, %8, %cst_12 {dimension_numbers = #tpu.dot_dimension_numbers<[1], [0], [0], [1], [0, 0, 1, 1], [], []>} : vector<144x128xbf16>, vector<128x128xbf16>, vector<144x128xf32> -> vector<144x128xf32>
    %10 = arith.addf %4, %9 : vector<144x128xf32>
    %c0_13 = arith.constant 0 : index
    %c2 = arith.constant 2 : index
    %c0_14 = arith.constant 0 : index
    %c0_15 = arith.constant 0 : index
    %11 = vector.load %arg1[%c0_13, %c2, %c0_14, %c0_15] : memref<1x7x144x128xbf16, #tpu.memory_space<vmem>>, vector<1x1x144x128xbf16>
    %12 = vector.shape_cast %11 : vector<1x1x144x128xbf16> to vector<144x128xbf16>
    %c2_16 = arith.constant 2 : index
    %c0_17 = arith.constant 0 : index
    %c0_18 = arith.constant 0 : index
    %13 = vector.load %arg2[%c2_16, %c0_17, %c0_18] : memref<7x128x128xbf16, #tpu.memory_space<vmem>>, vector<1x128x128xbf16>
    %14 = vector.shape_cast %13 : vector<1x128x128xbf16> to vector<128x128xbf16>
    %cst_19 = arith.constant dense<0.000000e+00> : vector<144x128xf32>
    %15 = tpu.matmul %12, %14, %cst_19 {dimension_numbers = #tpu.dot_dimension_numbers<[1], [0], [0], [1], [0, 0, 1, 1], [], []>} : vector<144x128xbf16>, vector<128x128xbf16>, vector<144x128xf32> -> vector<144x128xf32>
    %16 = arith.addf %10, %15 : vector<144x128xf32>
    %c0_20 = arith.constant 0 : index
    %c3 = arith.constant 3 : index
    %c0_21 = arith.constant 0 : index
    %c0_22 = arith.constant 0 : index
    %17 = vector.load %arg1[%c0_20, %c3, %c0_21, %c0_22] : memref<1x7x144x128xbf16, #tpu.memory_space<vmem>>, vector<1x1x144x128xbf16>
    %18 = vector.shape_cast %17 : vector<1x1x144x128xbf16> to vector<144x128xbf16>
    %c3_23 = arith.constant 3 : index
    %c0_24 = arith.constant 0 : index
    %c0_25 = arith.constant 0 : index
    %19 = vector.load %arg2[%c3_23, %c0_24, %c0_25] : memref<7x128x128xbf16, #tpu.memory_space<vmem>>, vector<1x128x128xbf16>
    %20 = vector.shape_cast %19 : vector<1x128x128xbf16> to vector<128x128xbf16>
    %cst_26 = arith.constant dense<0.000000e+00> : vector<144x128xf32>
    %21 = tpu.matmul %18, %20, %cst_26 {dimension_numbers = #tpu.dot_dimension_numbers<[1], [0], [0], [1], [0, 0, 1, 1], [], []>} : vector<144x128xbf16>, vector<128x128xbf16>, vector<144x128xf32> -> vector<144x128xf32>
    %22 = arith.addf %16, %21 : vector<144x128xf32>
    %c0_27 = arith.constant 0 : index
    %c4 = arith.constant 4 : index
    %c0_28 = arith.constant 0 : index
    %c0_29 = arith.constant 0 : index
    %23 = vector.load %arg1[%c0_27, %c4, %c0_28, %c0_29] : memref<1x7x144x128xbf16, #tpu.memory_space<vmem>>, vector<1x1x144x128xbf16>
    %24 = vector.shape_cast %23 : vector<1x1x144x128xbf16> to vector<144x128xbf16>
    %c4_30 = arith.constant 4 : index
    %c0_31 = arith.constant 0 : index
    %c0_32 = arith.constant 0 : index
    %25 = vector.load %arg2[%c4_30, %c0_31, %c0_32] : memref<7x128x128xbf16, #tpu.memory_space<vmem>>, vector<1x128x128xbf16>
    %26 = vector.shape_cast %25 : vector<1x128x128xbf16> to vector<128x128xbf16>
    %cst_33 = arith.constant dense<0.000000e+00> : vector<144x128xf32>
    %27 = tpu.matmul %24, %26, %cst_33 {dimension_numbers = #tpu.dot_dimension_numbers<[1], [0], [0], [1], [0, 0, 1, 1], [], []>} : vector<144x128xbf16>, vector<128x128xbf16>, vector<144x128xf32> -> vector<144x128xf32>
    %28 = arith.addf %22, %27 : vector<144x128xf32>
    %c0_34 = arith.constant 0 : index
    %c5 = arith.constant 5 : index
    %c0_35 = arith.constant 0 : index
    %c0_36 = arith.constant 0 : index
    %29 = vector.load %arg1[%c0_34, %c5, %c0_35, %c0_36] : memref<1x7x144x128xbf16, #tpu.memory_space<vmem>>, vector<1x1x144x128xbf16>
    %30 = vector.shape_cast %29 : vector<1x1x144x128xbf16> to vector<144x128xbf16>
    %c5_37 = arith.constant 5 : index
    %c0_38 = arith.constant 0 : index
    %c0_39 = arith.constant 0 : index
    %31 = vector.load %arg2[%c5_37, %c0_38, %c0_39] : memref<7x128x128xbf16, #tpu.memory_space<vmem>>, vector<1x128x128xbf16>
    %32 = vector.shape_cast %31 : vector<1x128x128xbf16> to vector<128x128xbf16>
    %cst_40 = arith.constant dense<0.000000e+00> : vector<144x128xf32>
    %33 = tpu.matmul %30, %32, %cst_40 {dimension_numbers = #tpu.dot_dimension_numbers<[1], [0], [0], [1], [0, 0, 1, 1], [], []>} : vector<144x128xbf16>, vector<128x128xbf16>, vector<144x128xf32> -> vector<144x128xf32>
    %34 = arith.addf %28, %33 : vector<144x128xf32>
    %c0_41 = arith.constant 0 : index
    %c6 = arith.constant 6 : index
    %c0_42 = arith.constant 0 : index
    %c0_43 = arith.constant 0 : index
    %35 = vector.load %arg1[%c0_41, %c6, %c0_42, %c0_43] : memref<1x7x144x128xbf16, #tpu.memory_space<vmem>>, vector<1x1x144x128xbf16>
    %36 = vector.shape_cast %35 : vector<1x1x144x128xbf16> to vector<144x128xbf16>
    %c6_44 = arith.constant 6 : index
    %c0_45 = arith.constant 0 : index
    %c0_46 = arith.constant 0 : index
    %37 = vector.load %arg2[%c6_44, %c0_45, %c0_46] : memref<7x128x128xbf16, #tpu.memory_space<vmem>>, vector<1x128x128xbf16>
    %38 = vector.shape_cast %37 : vector<1x128x128xbf16> to vector<128x128xbf16>
    %cst_47 = arith.constant dense<0.000000e+00> : vector<144x128xf32>
    %39 = tpu.matmul %36, %38, %cst_47 {dimension_numbers = #tpu.dot_dimension_numbers<[1], [0], [0], [1], [0, 0, 1, 1], [], []>} : vector<144x128xbf16>, vector<128x128xbf16>, vector<144x128xf32> -> vector<144x128xf32>
    %40 = arith.addf %34, %39 : vector<144x128xf32>
    %c0_48 = arith.constant 0 : index
    %c0_49 = arith.constant 0 : index
    %41 = vector.load %arg3[%c0_48, %c0_49] : memref<1x128xf32, #tpu.memory_space<vmem>>, vector<1x128xf32>
    %42 = vector.broadcast %41 : vector<1x128xf32> to vector<144x128xf32>
    %43 = arith.addf %40, %42 : vector<144x128xf32>
    %cst_50 = arith.constant 0.00999999977 : f32
    %44 = vector.broadcast %cst_50 : f32 to vector<144x128xf32>
    %45 = arith.mulf %44, %43 : vector<144x128xf32>
    %46 = arith.maximumf %43, %45 : vector<144x128xf32>
    %47 = vector.shape_cast %46 : vector<144x128xf32> to vector<6x2x12x128xf32>
    %48 = vector.extract_strided_slice %47 {offsets = [0, 0, 0, 0], sizes = [6, 1, 12, 128], strides = [1, 1, 1, 1]} : vector<6x2x12x128xf32> to vector<6x1x12x128xf32>
    %49 = vector.shape_cast %48 : vector<6x1x12x128xf32> to vector<6x12x128xf32>
    %50 = vector.extract_strided_slice %47 {offsets = [0, 1, 0, 0], sizes = [6, 1, 12, 128], strides = [1, 1, 1, 1]} : vector<6x2x12x128xf32> to vector<6x1x12x128xf32>
    %51 = vector.shape_cast %50 : vector<6x1x12x128xf32> to vector<6x12x128xf32>
    %52 = arith.maximumf %49, %51 : vector<6x12x128xf32>
    %53 = vector.shape_cast %52 : vector<6x12x128xf32> to vector<6x6x2x128xf32>
    %cst_51 = arith.constant dense<0xFF800000> : vector<6x6x128xf32>
    %54 = vector.multi_reduction <maximumf>, %53, %cst_51 [2] : vector<6x6x2x128xf32> to vector<6x6x128xf32>
    %55 = vector.shape_cast %54 : vector<6x6x128xf32> to vector<36x128xf32>
    %56 = arith.truncf %55 : vector<36x128xf32> to vector<36x128xbf16>
    %c0_52 = arith.constant 0 : index
    %c0_53 = arith.constant 0 : index
    %c0_54 = arith.constant 0 : index
    %57 = vector.load %arg4[%c0_52, %c0_53, %c0_54] : memref<1x36x128xbf16, #tpu.memory_space<vmem>>, vector<1x36x128xbf16>
    %58 = vector.shape_cast %57 : vector<1x36x128xbf16> to vector<36x128xbf16>
    %59 = vector.shape_cast %56 : vector<36x128xbf16> to vector<1x36x128xbf16>
    tpu.vector_store %arg4[%c0_52, %c0_53, %c0_54], %59 {strides = array<i32>} : memref<1x36x128xbf16, #tpu.memory_space<vmem>>, vector<1x36x128xbf16>,
    return
  }
  func.func @transform_0(%arg0: i32) -> (i32, i32, i32, i32) {
    %c0_i32 = arith.constant 0 : i32
    %c0_i32_0 = arith.constant 0 : i32
    %c0_i32_1 = arith.constant 0 : i32
    %c0_i32_2 = arith.constant 0 : i32
    return %arg0, %c0_i32, %c0_i32_0, %c0_i32_1 : i32, i32, i32, i32
  }
  func.func @transform_1(%arg0: i32) -> (i32, i32, i32) {
    %c0_i32 = arith.constant 0 : i32
    %c0_i32_0 = arith.constant 0 : i32
    %c0_i32_1 = arith.constant 0 : i32
    %c0_i32_2 = arith.constant 0 : i32
    return %c0_i32, %c0_i32_0, %c0_i32_1 : i32, i32, i32
  }
  func.func @transform_2(%arg0: i32) -> (i32, i32) {
    %c0_i32 = arith.constant 0 : i32
    %c0_i32_0 = arith.constant 0 : i32
    %c0_i32_1 = arith.constant 0 : i32
    return %c0_i32, %c0_i32_0 : i32, i32
  }
  func.func @transform_3(%arg0: i32) -> (i32, i32, i32) {
    %c0_i32 = arith.constant 0 : i32
    %c0_i32_0 = arith.constant 0 : i32
    %c0_i32_1 = arith.constant 0 : i32
    return %arg0, %c0_i32, %c0_i32_0 : i32, i32, i32
  }
}

</mosaic_0001>

<bundles_post_ra>
// kernel: tpu_custom_call.1
= control target key start
LH: loop header
LB: loop body
LE: loop exit
PB: predicated region body
PF: predicated region fallthrough
CT: control target
= control target key end

     0   :  { %8 = vsyncpa [#allocation3], 0  ;;  %s4776_s0 = inlined_call_operand.hbm [shape: bf16[2,7,144,128], index: 0, kind: input, shape index: {}]   ;;  %s4777_s1 = inlined_call_operand.hbm [shape: bf16[7,128,128], index: 1, kind: input, shape index: {}]   ;;  %s4778_s2 = inlined_call_operand.vmem [shape: f32[1,128], index: 2, kind: input, shape index: {}]   ;;  %s4779_s3 = inlined_call_operand.vmem [shape: bf16[2,36,128], index: 3, kind: output, shape index: {}]  }
   0x1   :  { %10 = vsyncpa [#allocation3 + $0x1], 0 }
   0x2   :  { %11 = vsyncpa [#allocation5], 0  ;;  %s4002_s12 = smov 0   ;;  %s4004_s13 = smov 0  }
   0x3   :  { %s4006_s14 = smov 0   ;;  %s4008_s15 = smov 0  }
   0x4 LB: > { %s4021_s16 = sadd.s32 4294967295, %s3973_s15   ;;  %p37_p0 = scmp.ne.s32.totalorder %s3965_s13, %s3961_s12  ;;  %s3973_s15 = sphi %s4008_s15, %s4794_s15   ;;  %s3969_s14 = sphi %s4006_s14, %s4793_s14   ;;  %s3965_s13 = sphi %s4004_s13, %s4792_s13   ;;  %s3961_s12 = sphi %s4002_s12, %s4791_s12  }
   0x5   : > { %p4780_p1 = scmp.eq.s32.totalorder %s4021_s16, 0  ;;  %p2891_p2 = scmp.ge.s32.totalorder %s3973_s15, 1 }
   0x6   : > { %p116_p3 = scmp.lt.s32.totalorder %s3973_s15, 3  ;;  %s3975_s19 = smov [#allocation4]  }
   0x7   : > { %p4029_p4 = por %p4780_p1, %p37_p0  ;;  %s128_s20 = sshll.u32 %s3975_s19, 4  ;;  %s129_s20 = int_to_ptr.vmem [resolvable:$true] %s128_s20 }
   0x8   : > { %p4033_p5 = pnand %p2891_p2, %p116_p3  ;;  %s4046_s22 = sadd.s32 1, %s3973_s15  }
   0x9   : > { %s4783_s17 = scalar_select %p4029_p4, 1, 0 }
   0xa   : > { %s4784_s18 = scalar_select %p4033_p5, 1, 0 }
   0xb   : > { %p3709_p6 = pneg %p4033_p5  ;;  %s24_s23 = sadd.s32 1, %s3969_s14 }
   0xc   : > { %s21_s24 = ssub.s32 %s3973_s15, %s4046_s22  ;;  %s3877_s27 = scalar_lea.hbm %s4777_s1, 7168 }
   0xd   : > { %p4041_p7 = pnand %p3709_p6, %p4780_p1  ;;  %p3878_p8 = scmp.ne.s32.totalorder %s4777_s1, %s3877_s27 }
   0xe   : > { %p3884_p12 = scmp.lt.u32.totalorder %s3877_s27, %s4777_s1 }
   0xf   : > { %p3879_p9 = pneg %p4041_p7 }
  0x11   : > { %p3880_p10 = pnand %p3879_p9, %p3878_p8 }
  0x13   : > { %p3881_p11 = pneg %p3880_p10 }
  0x15   : > { %p3886_p13 = pnand %p3884_p12, %p3881_p11 }
  0x17   : > { %3889 = shalt.err (!%p3886_p13)
}
  0x18   : > { %s3890_s5 = scalar_lea.vmem %s129_s20, 7168  ;;  %p3898_p6 = scmp.lt.s32.totalorder %s129_s20, %s129_s20 }
  0x19   : > { %p3891_p0 = scmp.ne.s32.totalorder %s129_s20, %s3890_s5  ;;  %p3899_p1 = scmp.lt.s32.totalorder %s3890_s5, %s3890_s5 }
  0x1b   : > { %p3893_p2 = pnand %p3891_p0, %p3879_p9  ;;  %p3900_p4 = por %p3899_p1, %p3898_p6 }
  0x1d   : > { %p3894_p3 = pneg %p3893_p2 }
  0x1f   : > { %p3901_p5 = pnand %p3900_p4, %p3894_p3 }
  0x21   : > { %3904 = shalt.err (!%p3901_p5)
}
  0x22   : > { %s3976_s6 = smov 64   ;;  %s3977_s7 = smov 4  }
  0x23   : > { %3712 = dma.hbm_to_vmem [thread:$0]  (!%p4041_p7), %s4777_s1, 7168, %s129_s20, [#allocation5], %s3976_s6, %s3976_s6, %s3977_s7  }
  0x24   : > { %p22_p1 = scmp.eq.s32.totalorder %s21_s24, 0  ;;  %p31_p4 = scmp.ne.s32.totalorder %s3969_s14, %s3965_s13 }
  0x25   : > { %p32_p5 = scmp.eq.s32.totalorder %s3973_s15, 0  ;;  %p3718_p8 = scmp.lt.s32.totalorder %s3973_s15, 2 }
  0x26   : > { %s4075_s10 = scalar_select %p22_p1, %s3969_s14, %s24_s23  }
  0x27   : > { %p33_p9 = por %p32_p5, %p31_p4  ;;  %s145_s11 = sand.u32 1, %s3969_s14  }
  0x28   : > { %s3699_s12 = smul.u32 504, %s145_s11  ;;  %s3910_s30 = scalar_lea.hbm %s4776_s0, 16128 }
  0x29   : > { %s3700_s19 = smul.u32 8064, %s3973_s15  ;;  %p4079_p10 = pnand %p3718_p8, %p33_p9 }
  0x2a   : > { %s149_s23 = scalar_lea.vmem [#allocation2], %s3699_s12  ;;  %s4090_s15 = scalar_lea.sflag [#allocation3], %s145_s11 }
  0x2b   : > { %s4086_s20 = scalar_lea.hbm %s4776_s0, %s3700_s19  ;;  %s156_s24 = sshll.u32 %s149_s23, 4  ;;  %s4088_s24 = int_to_ptr.vmem [resolvable:$true] %s156_s24 }
  0x2c   : > { %s3905_s27 = scalar_lea.hbm %s4086_s20, 8064  ;;  %p3907_p11 = pneg %p4079_p10 }
  0x2d   : > { %p3906_p7 = scmp.ne.s32.totalorder %s4086_s20, %s3905_s27  ;;  %p3911_p0 = scmp.lt.u32.totalorder %s4086_s20, %s4776_s0 }
  0x2e   : > { %p3912_p2 = scmp.lt.u32.totalorder %s3910_s30, %s3905_s27  ;;  %p3914_p6 = scmp.lt.u32.totalorder %s3905_s27, %s4086_s20 }
  0x2f   : > { %p3908_p12 = pnand %p3907_p11, %p3906_p7 }
  0x30   : > { %p3913_p3 = por %p3912_p2, %p3911_p0 }
  0x31   : > { %p3909_p13 = pneg %p3908_p12 }
  0x32   : > { %p3915_p1 = por %p3914_p6, %p3913_p3 }
  0x34   : > { %p3916_p4 = pnand %p3915_p1, %p3909_p13 }
  0x36   : > { %3919 = shalt.err (!%p3916_p4)
}
  0x37   : > { %s3920_s8 = scalar_lea.vmem %s4088_s24, 8064  ;;  %s3978_s9 = smov [#allocation2]  }
  0x38   : > { %p3921_p5 = scmp.ne.s32.totalorder %s4088_s24, %s3920_s8  ;;  %s3925_s11 = sshll.u32 %s3978_s9, 4  ;;  %s3926_s11 = int_to_ptr.vmem [resolvable:$false] %s3925_s11 }
  0x39   : > { %s3927_s12 = scalar_lea.vmem %s3926_s11, 16128  ;;  %p3928_p7 = scmp.lt.s32.totalorder %s4088_s24, %s3926_s11 }
  0x3a   : > { %p3923_p8 = pnand %p3921_p5, %p3907_p11  ;;  %p3929_p12 = scmp.lt.s32.totalorder %s3927_s12, %s3920_s8 }
  0x3c   : > { %p3924_p9 = pneg %p3923_p8  ;;  %p3930_p0 = por %p3929_p12, %p3928_p7 }
  0x3e   : > { %p3931_p2 = pnand %p3930_p0, %p3924_p9 }
  0x40   : > { %3934 = shalt.err (!%p3931_p2)
}
  0x41   : > { %3716 = dma.hbm_to_vmem [thread:$0]  (!%p4079_p10), %s4086_s20, 8064, %s4088_s24, %s4090_s15, %s3976_s6, %s3976_s6, %s3977_s7  }
  0x42   : > { %p4787_p11 = scmp.ne.s32.totalorder %s4784_s18, 0 }
  0x43   : > { %s170_s19 = sand.u32 (!%p4787_p11), 1, %s3965_s13   ;;  %p4788_p13 = scmp.ne.s32.totalorder (!%p4787_p11), %s4783_s17, 0 }
  0x44   : > { %168 = sbr.rel (%p4787_p11) target bundleno = 667 (0x29b), region = 32  ;;  %s171_s26 = scalar_lea.sflag (!%p4787_p11), [#allocation3], %s170_s19 }
  0x45   : > { %s3701_s21 = smul.u32 (!%p4787_p11), 504, %s170_s19 }
  0x47   : > { %s4124_s23 = scalar_lea.vmem (!%p4787_p11), [#allocation2], %s3701_s21 }
  0x4b   : > { %3952 = dma.done.wait (%p4788_p13), %s171_s26, 8064  }
  0x4c   : > { %3954 = vsyncadd (%p4788_p13), %s171_s26, 4294959232  ;;  %p4789_p3 = scmp.eq.s32.totalorder %s4021_s16, 0 }
  0x4e   : > { %3956 = dma.done.wait (%p4789_p3), [#allocation5], 7168   ;;  %p4790_p10 = pmov %p4789_p3 }
  0x4f   : > { %v3979_v0 = vmov 0.0   ;;  %vm3980_vm0 = vmmov 0   ;;  %v3758_v1 = vld [vmem:[#allocation4 + $0x40] sm:$0xff]   ;;  %v3759_v2 = vld [vmem:[#allocation4 + $0x48] sm:$0xff]   ;;  %v3760_v3 = vld [vmem:[#allocation4 + $0x50] sm:$0xff]   ;;  %vm2327_vm1 = vcmask 1041408  }
  0x50   : > { %3958 = vsyncadd (%p4790_p10), [#allocation5], 4294960128  ;;  %3683 = vmatprep.subr.bf16.mxu1 %v3979_v0  ;;  %3319 = vmatprep.subr.bf16.mxu0 %v3979_v0  ;;  %v3761_v4 = vld [vmem:[#allocation4 + $0x58] sm:$0xff]   ;;  %v3762_v5 = vld [vmem:[#allocation4 + $0x60] sm:$0xff]   ;;  %vm2760_vm2 = vcmask 1041409   ;;  %vm2762_vm3 = vcmask 1042434  }
  0x51   : > { %3351 = vmatprep.mubr.msk.bf16.mxu1 %vm3980_vm0, %v3979_v0  ;;  %3335 = vmatprep.mubr.msk.bf16.mxu0 %vm3980_vm0, %v3979_v0  ;;  %v3763_v6 = vld [vmem:[#allocation4 + $0x68] sm:$0xff]   ;;  %v3764_v7 = vld [vmem:[#allocation4 + $0x70] sm:$0xff]   ;;  %v3765_v8 = vld [vmem:[#allocation4 + $0x78] sm:$0xff]   ;;  %vm2764_vm4 = vcmask 1043459   ;;  %vm2766_vm5 = vcmask 1044484   ;;  %vm2768_vm6 = vcmask 1045509  }
  0x52   : > { %3691 = vmatpush3.bf16.msra.mxu1 %v3758_v1  ;;  %3320 = vmatpush3.bf16.msra.mxu0 %v3758_v1  ;;  %v3766_v9 = vld [vmem:[%s4124_s23 + $0x68] sm:$0xff]   ;;  %v3767_v11 = vld [vmem:[#allocation4] sm:$0xff]   ;;  %v3768_v13 = vld [vmem:[#allocation4 + $0x8] sm:$0xff]   ;;  %vm2770_vm7 = vcmask 1046534   ;;  %p201_p6 = scmp.lt.s32.totalorder %s4021_s16, 1  ;;  %vm2772_vm8 = vcmask 1047559  }
  0x53   : > { %3684 = vmatprep.subr.bf16.mxu1 %v3979_v0  ;;  %3321 = vmatprep.subr.bf16.mxu0 %v3979_v0  ;;  %v3769_v10 = vld [vmem:[%s4124_s23 + $0x48] sm:$0xff]   ;;  %v3771_v12 = vld [vmem:[#allocation4 + $0x80] sm:$0xff]   ;;  %v3773_v14 = vld [vmem:[#allocation4 + $0x88] sm:$0xff]  }
  0x54   : > { %v3770_v15 = vld [vmem:[%s4124_s23 + $0x70] sm:$0xff]   ;;  %v3772_v17 = vld [vmem:[#allocation4 + $0x10] sm:$0xff]   ;;  %v3775_v21 = vld [vmem:[%s4124_s23 + $0x78] sm:$0xff]   ;;  %s4796_s16 = smov (!%p201_p6, %s4021_s16), 1 }
  0x55   : > { %v3774_v16 = vld [vmem:[%s4124_s23 + $0x50] sm:$0xff]   ;;  %v3777_v18 = vld [vmem:[#allocation4 + $0x90] sm:$0xff]   ;;  %v3780_v22 = vld [vmem:[%s4124_s23 + $0x58] sm:$0xff]   ;;  %s3702_s6 = smul.u32 20, %s4796_s16 }
  0x56   : > { %3692 = vmatpush3.bf16.msra.mxu1 %v3759_v2  ;;  %3322 = vmatpush3.bf16.msra.mxu0 %v3759_v2  ;;  %v3776_v19 = vld [vmem:[#allocation4 + $0x18] sm:$0xff]   ;;  %v3778_v23 = vld [vmem:[#allocation4 + $0x20] sm:$0xff]   ;;  %v3783_v25 = vld [vmem:[#allocation4 + $0x28] sm:$0xff]  }
  0x57   : > { %3685 = vmatprep.subr.bf16.mxu1 %v3979_v0  ;;  %3323 = vmatprep.subr.bf16.mxu0 %v3979_v0  ;;  %v3779_v20 = vld [vmem:[#allocation4 + $0x98] sm:$0xff]   ;;  %v3782_v24 = vld [vmem:[#allocation4 + $0xa0] sm:$0xff]   ;;  %v3784_v26 = vld [vmem:[#allocation4 + $0xa8] sm:$0xff]   ;;  %s4623_s25 = scalar_lea.vmem %s4779_s3, %s3702_s6 }
  0x58   : > { %v3781_v27 = vld [vmem:[%s4124_s23 + $0x80] sm:$0xff]   ;;  %v3789_v31 = vld [vmem:[#allocation4 + $0x38] sm:$0xff]   ;;  %v3794_v35 = vld [vmem:[#allocation4 + $0x100] sm:$0xff]  }
  0x59   : > { %v3786_v28 = vld [vmem:[%s4124_s23 + $0x60] sm:$0xff]   ;;  %v3790_v32 = vld [vmem:[#allocation4 + $0xb8] sm:$0xff]   ;;  %v3793_v38 = vld [vmem:[#allocation4 + $0xc0] sm:$0xff]  }
  0x5a   : > { %3693 = vmatpush3.bf16.msra.mxu1 %v3760_v3  ;;  %3324 = vmatpush3.bf16.msra.mxu0 %v3760_v3  ;;  %v3785_v29 = vld [vmem:[#allocation4 + $0x30] sm:$0xff]   ;;  %v3792_v34 = vld [vmem:[%s4124_s23 + $0x90] sm:$0xff]   ;;  %v3798_v36 = vld [vmem:[#allocation4 + $0x108] sm:$0xff]  }
  0x5b   : > { %3686 = vmatprep.subr.bf16.mxu1 %v3979_v0  ;;  %3325 = vmatprep.subr.bf16.mxu0 %v3979_v0  ;;  %v3788_v30 = vld [vmem:[#allocation4 + $0xb0] sm:$0xff]   ;;  %v3796_v39 = vld [vmem:[%s4124_s23 + $0x98] sm:$0xff]   ;;  %v3806_v42 = vld [vmem:[#allocation4 + $0x118] sm:$0xff]  }
  0x5c   : > { %v3787_v33 = vld [vmem:[%s4124_s23 + $0x88] sm:$0xff]   ;;  %v3791_v37 = vld [vmem:[%s4124_s23] sm:$0xff]   ;;  %v3810_v46 = vld [vmem:[#allocation4 + $0x120] sm:$0xff]  }
  0x5d   : > { %v3802_v40 = vld [vmem:[#allocation4 + $0x110] sm:$0xff]   ;;  %v3797_v41 = vld [vmem:[#allocation4 + $0xc8] sm:$0xff]   ;;  %v3805_v47 = vld [vmem:[#allocation4 + $0xd8] sm:$0xff]  }
  0x5e   : > { %3694 = vmatpush3.bf16.msra.mxu1 %v3761_v4  ;;  %3326 = vmatpush3.bf16.msra.mxu0 %v3761_v4  ;;  %v3795_v43 = vld [vmem:[%s4124_s23 + $0x8] sm:$0xff]   ;;  %v3800_v45 = vld [vmem:[%s4124_s23 + $0xa0] sm:$0xff]   ;;  %v3799_v49 = vld [vmem:[%s4124_s23 + $0x10] sm:$0xff]  }
  0x5f   : > { %3687 = vmatprep.subr.bf16.mxu1 %v3979_v0  ;;  %3327 = vmatprep.subr.bf16.mxu0 %v3979_v0  ;;  %v3801_v44 = vld [vmem:[#allocation4 + $0xd0] sm:$0xff]   ;;  %v3816_v48 = vld [vmem:[#allocation4 + $0x128] sm:$0xff]   ;;  %v3809_v50 = vld [vmem:[#allocation4 + $0xe0] sm:$0xff]  }
  0x60   : > { %v3804_v51 = vld [vmem:[%s4124_s23 + $0xa8] sm:$0xff]   ;;  %v3813_v53 = vld [vmem:[#allocation4 + $0xe8] sm:$0xff]   ;;  %v3808_v57 = vld [vmem:[%s4124_s23 + $0xb0] sm:$0xff]  }
  0x61   : > { %v3820_v52 = vld [vmem:[#allocation4 + $0x130] sm:$0xff]   ;;  %v3824_v54 = vld [vmem:[#allocation4 + $0x138] sm:$0xff]   ;;  %v3803_v55 = vld [vmem:[%s4124_s23 + $0x18] sm:$0xff]  }
  0x62   : > { %3695 = vmatpush3.bf16.msra.mxu1 %v3762_v5  ;;  %3328 = vmatpush3.bf16.msra.mxu0 %v3762_v5  ;;  %v3817_v56 = vld [vmem:[#allocation4 + $0xf0] sm:$0xff]   ;;  %v3823_v58 = vld [vmem:[#allocation4 + $0xf8] sm:$0xff]   ;;  %v3812_v60 = vld [vmem:[%s4124_s23 + $0xb8] sm:$0xff]  }
  0x63   : > { %3688 = vmatprep.subr.bf16.mxu1 %v3979_v0  ;;  %3329 = vmatprep.subr.bf16.mxu0 %v3979_v0  ;;  %v3807_v59 = vld [vmem:[%s4124_s23 + $0x20] sm:$0xff]   ;;  %v3811_v61 = vld [vmem:[%s4124_s23 + $0x28] sm:$0xff]   ;;  %v3814_v63 = vld [vmem:[%s4124_s23 + $0x30] sm:$0xff]  }
  0x64   : > { %v3815_v62 = vld [vmem:[%s4124_s23 + $0xc0] sm:$0xff]   ;;  %v3819_v1 = vld [vmem:[%s4124_s23 + $0xc8] sm:$0xff]   ;;  %v3818_v2 = vld [vmem:[%s4124_s23 + $0x38] sm:$0xff]  }
  0x65   : > { %v3822_v3 = vld [vmem:[%s4124_s23 + $0xd0] sm:$0xff]   ;;  %v3821_v4 = vld [vmem:[%s4124_s23 + $0x40] sm:$0xff]  }
  0x66   : > { %3696 = vmatpush3.bf16.msra.mxu1 %v3763_v6  ;;  %3330 = vmatpush3.bf16.msra.mxu0 %v3763_v6  ;;  %v3826_v5 = vld [vmem:[%s4124_s23 + $0x120] sm:$0xff]   ;;  %v3828_v6 = vld [vmem:[#allocation4 + $0x180] sm:$0xff]  }
  0x67   : > { %3689 = vmatprep.subr.bf16.mxu1 %v3979_v0  ;;  %3331 = vmatprep.subr.bf16.mxu0 %v3979_v0 }
  0x6a   : > { %3697 = vmatpush3.bf16.msra.mxu1 %v3764_v7  ;;  %3332 = vmatpush3.bf16.msra.mxu0 %v3764_v7  ;;  %v3832_v7 = vld [vmem:[#allocation4 + $0x188] sm:$0xff]  }
  0x6b   : > { %3690 = vmatprep.subr.bf16.mxu1 %v3979_v0  ;;  %3333 = vmatprep.subr.bf16.mxu0 %v3979_v0 }
  0x6e   : > { %3698 = vmatpush3.bf16.msra.mxu1 %v3765_v8  ;;  %3334 = vmatpush3.bf16.msra.mxu0 %v3765_v8  ;;  %v3825_v8 = vld [vmem:[%s4124_s23 + $0xd8] sm:$0xff]  }
  0x6f   : > { %3371 = vmatprep.subr.bf16.mxu1 %v3979_v0  ;;  %3423 = vmatprep.subr.bf16.mxu0 %v3979_v0 }
  0x71   : > { %3352 = vmatmul.mubr.bf16.vlgmr.msra.gmra.mrb[0].mxu1 %v3766_v9  ;;  %3336 = vmatmul.mubr.bf16.vlgmr.msra.gmra.mrb[0].mxu0 %v3769_v10  ;;  %v3827_v9 = vld [vmem:[#allocation4 + $0x140] sm:$0xff]   ;;  %v3830_v10 = vld [vmem:[%s4124_s23 + $0x128] sm:$0xff]  }
  0x72   : > { %3372 = vmatpush3.bf16.msra.mxu1 %v3767_v11  ;;  %3355 = vmatprep.mubr.msk.bf16.mxu1 %vm3980_vm0, %v3979_v0  ;;  %v3836_v11 = vld [vmem:[#allocation4 + $0x190] sm:$0xff]  }
  0x73   : > { %3373 = vmatprep.subr.bf16.mxu1 %v3979_v0  ;;  %3424 = vmatpush3.bf16.msra.mxu0 %v3771_v12  ;;  %v3831_v12 = vld [vmem:[#allocation4 + $0x148] sm:$0xff]  }
  0x74   : > { %3425 = vmatprep.subr.bf16.mxu0 %v3979_v0  ;;  %3339 = vmatprep.mubr.msk.bf16.mxu0 %vm3980_vm0, %v3979_v0 }
  0x76   : > { %3374 = vmatpush3.bf16.msra.mxu1 %v3768_v13  ;;  %v3840_v13 = vld [vmem:[#allocation4 + $0x198] sm:$0xff]  }
  0x77   : > { %3375 = vmatprep.subr.bf16.mxu1 %v3979_v0  ;;  %3426 = vmatpush3.bf16.msra.mxu0 %v3773_v14  ;;  %v3829_v14 = vld [vmem:[%s4124_s23 + $0xe0] sm:$0xff]  }
  0x78   : > { %3427 = vmatprep.subr.bf16.mxu0 %v3979_v0 }
  0x79   : > { %3356 = vmatmul.mubr.bf16.gmra.mrb[4].mxu1 %v3770_v15  ;;  %3340 = vmatmul.mubr.bf16.gmra.mrb[4].mxu0 %v3774_v16  ;;  %v3835_v15 = vld [vmem:[#allocation4 + $0x150] sm:$0xff]   ;;  %v3834_v16 = vld [vmem:[%s4124_s23 + $0x130] sm:$0xff]  }
  0x7a   : > { %3376 = vmatpush3.bf16.msra.mxu1 %v3772_v17  ;;  %3359 = vmatprep.mubr.msk.bf16.mxu1 %vm3980_vm0, %v3979_v0  ;;  %v3844_v17 = vld [vmem:[#allocation4 + $0x1a0] sm:$0xff]  }
  0x7b   : > { %3377 = vmatprep.subr.bf16.mxu1 %v3979_v0  ;;  %3428 = vmatpush3.bf16.msra.mxu0 %v3777_v18  ;;  %v3839_v18 = vld [vmem:[#allocation4 + $0x158] sm:$0xff]  }
  0x7c   : > { %3429 = vmatprep.subr.bf16.mxu0 %v3979_v0  ;;  %3343 = vmatprep.mubr.msk.bf16.mxu0 %vm3980_vm0, %v3979_v0 }
  0x7e   : > { %3378 = vmatpush3.bf16.msra.mxu1 %v3776_v19  ;;  %v3850_v19 = vld [vmem:[#allocation4 + $0x1a8] sm:$0xff]  }
  0x7f   : > { %3379 = vmatprep.subr.bf16.mxu1 %v3979_v0  ;;  %3430 = vmatpush3.bf16.msra.mxu0 %v3779_v20  ;;  %v3833_v20 = vld [vmem:[%s4124_s23 + $0xe8] sm:$0xff]  }
  0x80   : > { %3431 = vmatprep.subr.bf16.mxu0 %v3979_v0 }
  0x81   : > { %3360 = vmatmul.mubr.bf16.gmra.mrb[8].mxu1 %v3775_v21  ;;  %3344 = vmatmul.mubr.bf16.gmra.mrb[8].mxu0 %v3780_v22  ;;  %v3843_v21 = vld [vmem:[#allocation4 + $0x160] sm:$0xff]  }
  0x82   : > { %3380 = vmatpush3.bf16.msra.mxu1 %v3778_v23  ;;  %3363 = vmatprep.mubr.msk.bf16.mxu1 %vm3980_vm0, %v3979_v0  ;;  %v3838_v22 = vld [vmem:[%s4124_s23 + $0x138] sm:$0xff]   ;;  %v3854_v23 = vld [vmem:[#allocation4 + $0x1b0] sm:$0xff]  }
  0x83   : > { %3381 = vmatprep.subr.bf16.mxu1 %v3979_v0  ;;  %3432 = vmatpush3.bf16.msra.mxu0 %v3782_v24  ;;  %v3847_v24 = vld [vmem:[#allocation4 + $0x168] sm:$0xff]  }
  0x84   : > { %3433 = vmatprep.subr.bf16.mxu0 %v3979_v0  ;;  %3347 = vmatprep.mubr.msk.bf16.mxu0 %vm3980_vm0, %v3979_v0 }
  0x86   : > { %3382 = vmatpush3.bf16.msra.mxu1 %v3783_v25  ;;  %v3858_v25 = vld [vmem:[#allocation4 + $0x1b8] sm:$0xff]  }
  0x87   : > { %3434 = vmatpush3.bf16.msra.mxu0 %v3784_v26  ;;  %3383 = vmatprep.subr.bf16.mxu1 %v3979_v0  ;;  %v3837_v26 = vld [vmem:[%s4124_s23 + $0xf0] sm:$0xff]  }
  0x88   : > { %3435 = vmatprep.subr.bf16.mxu0 %v3979_v0 }
  0x89   : > { %3364 = vmatmul.mubr.bf16.gmra.mrb[12].mxu1 %v3781_v27  ;;  %3348 = vmatmul.mubr.bf16.gmra.mrb[12].mxu0 %v3786_v28  ;;  %v3851_v27 = vld [vmem:[#allocation4 + $0x170] sm:$0xff]  }
  0x8a   : > { %3367 = vmatprep.mubr.msk.bf16.mxu1 %vm3980_vm0, %v3979_v0  ;;  %3384 = vmatpush3.bf16.msra.mxu1 %v3785_v29  ;;  %v3842_v28 = vld [vmem:[%s4124_s23 + $0x140] sm:$0xff]   ;;  %v3857_v29 = vld [vmem:[#allocation4 + $0x178] sm:$0xff]  }
  0x8b   : > { %3436 = vmatpush3.bf16.msra.mxu0 %v3788_v30  ;;  %3385 = vmatprep.subr.bf16.mxu1 %v3979_v0  ;;  %v3841_v30 = vld [vmem:[%s4124_s23 + $0xf8] sm:$0xff]  }
  0x8c   : > { %3437 = vmatprep.subr.bf16.mxu0 %v3979_v0  ;;  %3439 = vmatprep.mubr.msk.bf16.mxu0 %vm3980_vm0, %v3979_v0 }
  0x8e   : > { %3386 = vmatpush3.bf16.msra.mxu1 %v3789_v31  ;;  %v3846_v31 = vld [vmem:[%s4124_s23 + $0x148] sm:$0xff]  }
  0x8f   : > { %3438 = vmatpush3.bf16.msra.mxu0 %v3790_v32  ;;  %3475 = vmatprep.subr.bf16.mxu1 %v3979_v0  ;;  %v3845_v32 = vld [vmem:[%s4124_s23 + $0x100] sm:$0xff]  }
  0x90   : > { %3527 = vmatprep.subr.bf16.mxu0 %v3979_v0 }
  0x91   : > { %3368 = vmatmul.mubr.bf16.gmra.mrb[16].mxu1 %v3787_v33  ;;  %v3849_v33 = vld [vmem:[%s4124_s23 + $0x150] sm:$0xff]  }
  0x92   : > { %3387 = vmatprep.mubr.msk.bf16.mxu1 %vm3980_vm0, %v3979_v0  ;;  %3440 = vmatmul.mubr.bf16.vlgmr.msra.gmra.mrb[16].mxu0 %v3792_v34  ;;  %v3848_v34 = vld [vmem:[%s4124_s23 + $0x108] sm:$0xff]  }
  0x93   : > { %3528 = vmatpush3.bf16.msra.mxu0 %v3794_v35  ;;  %3443 = vmatprep.mubr.msk.bf16.mxu0 %vm3980_vm0, %v3979_v0  ;;  %v3853_v35 = vld [vmem:[%s4124_s23 + $0x158] sm:$0xff]  }
  0x94   : > { %3529 = vmatprep.subr.bf16.mxu0 %v3979_v0 }
  0x97   : > { %3530 = vmatpush3.bf16.msra.mxu0 %v3798_v36  ;;  %v3852_v36 = vld [vmem:[%s4124_s23 + $0x110] sm:$0xff]  }
  0x98   : > { %3531 = vmatprep.subr.bf16.mxu0 %v3979_v0 }
  0x99   : > { %3388 = vmatmul.mubr.bf16.vlgmr.msra.gmra.mrb[20].mxu1 %v3791_v37  ;;  %v3856_v37 = vld [vmem:[%s4124_s23 + $0x160] sm:$0xff]  }
  0x9a   : > { %3476 = vmatpush3.bf16.msra.mxu1 %v3793_v38  ;;  %3391 = vmatprep.mubr.msk.bf16.mxu1 %vm3980_vm0, %v3979_v0  ;;  %v3855_v38 = vld [vmem:[%s4124_s23 + $0x118] sm:$0xff]  }
  0x9b   : > { %3444 = vmatmul.mubr.bf16.gmra.mrb[20].mxu0 %v3796_v39  ;;  %3477 = vmatprep.subr.bf16.mxu1 %v3979_v0  ;;  %v3860_v39 = vld [vmem:[%s4124_s23 + $0x1b0] sm:$0xff]  }
  0x9c   : > { %3447 = vmatprep.mubr.msk.bf16.mxu0 %vm3980_vm0, %v3979_v0  ;;  %3532 = vmatpush3.bf16.msra.mxu0 %v3802_v40  ;;  %v3859_v40 = vld [vmem:[%s4124_s23 + $0x168] sm:$0xff]  }
  0x9d   : > { %3533 = vmatprep.subr.bf16.mxu0 %v3979_v0 }
  0x9e   : > { %3478 = vmatpush3.bf16.msra.mxu1 %v3797_v41  ;;  %v3862_v41 = vld [vmem:[%s4124_s23 + $0x1b8] sm:$0xff]  }
  0x9f   : > { %3479 = vmatprep.subr.bf16.mxu1 %v3979_v0 }
  0xa0   : > { %3534 = vmatpush3.bf16.msra.mxu0 %v3806_v42  ;;  %v3861_v42 = vld [vmem:[%s4124_s23 + $0x170] sm:$0xff]  }
  0xa1   : > { %3392 = vmatmul.mubr.bf16.gmra.mrb[24].mxu1 %v3795_v43  ;;  %3535 = vmatprep.subr.bf16.mxu0 %v3979_v0  ;;  %v3864_v43 = vld [vmem:[%s4124_s23 + $0x1c0] sm:$0xff]  }
  0xa2   : > { %3395 = vmatprep.mubr.msk.bf16.mxu1 %vm3980_vm0, %v3979_v0  ;;  %3480 = vmatpush3.bf16.msra.mxu1 %v3801_v44  ;;  %v3863_v44 = vld [vmem:[%s4124_s23 + $0x178] sm:$0xff]  }
  0xa3   : > { %3448 = vmatmul.mubr.bf16.gmra.mrb[24].mxu0 %v3800_v45  ;;  %3481 = vmatprep.subr.bf16.mxu1 %v3979_v0  ;;  %v3866_v45 = vld [vmem:[%s4124_s23 + $0x1c8] sm:$0xff]  }
  0xa4   : > { %3451 = vmatprep.mubr.msk.bf16.mxu0 %vm3980_vm0, %v3979_v0  ;;  %3536 = vmatpush3.bf16.msra.mxu0 %v3810_v46  ;;  %v3865_v46 = vld [vmem:[%s4124_s23 + $0x180] sm:$0xff]  }
  0xa5   : > { %3537 = vmatprep.subr.bf16.mxu0 %v3979_v0 }
  0xa6   : > { %3482 = vmatpush3.bf16.msra.mxu1 %v3805_v47  ;;  %v3868_v47 = vld [vmem:[%s4124_s23 + $0x1d0] sm:$0xff]  }
  0xa7   : > { %3483 = vmatprep.subr.bf16.mxu1 %v3979_v0 }
  0xa8   : > { %3538 = vmatpush3.bf16.msra.mxu0 %v3816_v48 }
  0xa9   : > { %3396 = vmatmul.mubr.bf16.gmra.mrb[28].mxu1 %v3799_v49  ;;  %3539 = vmatprep.subr.bf16.mxu0 %v3979_v0 }
  0xaa   : > { %3399 = vmatprep.mubr.msk.bf16.mxu1 %vm3980_vm0, %v3979_v0  ;;  %3484 = vmatpush3.bf16.msra.mxu1 %v3809_v50 }
  0xab   : > { %3452 = vmatmul.mubr.bf16.gmra.mrb[28].mxu0 %v3804_v51  ;;  %3485 = vmatprep.subr.bf16.mxu1 %v3979_v0  ;;  %v3867_v51 = vld [vmem:[%s4124_s23 + $0x188] sm:$0xff]  }
  0xac   : > { %3455 = vmatprep.mubr.msk.bf16.mxu0 %vm3980_vm0, %v3979_v0  ;;  %3540 = vmatpush3.bf16.msra.mxu0 %v3820_v52 }
  0xad   : > { %3541 = vmatprep.subr.bf16.mxu0 %v3979_v0 }
  0xae   : > { %3486 = vmatpush3.bf16.msra.mxu1 %v3813_v53 }
  0xaf   : > { %3487 = vmatprep.subr.bf16.mxu1 %v3979_v0 }
  0xb0   : > { %3542 = vmatpush3.bf16.msra.mxu0 %v3824_v54 }
  0xb1   : > { %3400 = vmatmul.mubr.bf16.gmra.mrb[32].mxu1 %v3803_v55  ;;  %3631 = vmatprep.subr.bf16.mxu0 %v3979_v0 }
  0xb2   : > { %3403 = vmatprep.mubr.msk.bf16.mxu1 %vm3980_vm0, %v3979_v0  ;;  %3488 = vmatpush3.bf16.msra.mxu1 %v3817_v56 }
  0xb3   : > { %3456 = vmatmul.mubr.bf16.gmra.mrb[32].mxu0 %v3808_v57  ;;  %3489 = vmatprep.subr.bf16.mxu1 %v3979_v0  ;;  %v3870_v57 = vld [vmem:[%s4124_s23 + $0x1d8] sm:$0xff]  }
  0xb4   : > { %3459 = vmatprep.mubr.msk.bf16.mxu0 %vm3980_vm0, %v3979_v0 }
  0xb6   : > { %3490 = vmatpush3.bf16.msra.mxu1 %v3823_v58 }
  0xb7   : > { %3579 = vmatprep.subr.bf16.mxu1 %v3979_v0 }
  0xb9   : > { %3404 = vmatmul.mubr.bf16.gmra.mrb[36].mxu1 %v3807_v59 }
  0xba   : > { %3407 = vmatprep.mubr.msk.bf16.mxu1 %vm3980_vm0, %v3979_v0 }
  0xbb   : > { %3460 = vmatmul.mubr.bf16.gmra.mrb[36].mxu0 %v3812_v60 }
  0xbc   : > { %3463 = vmatprep.mubr.msk.bf16.mxu0 %vm3980_vm0, %v3979_v0 }
  0xc1   : > { %3408 = vmatmul.mubr.bf16.gmra.mrb[40].mxu1 %v3811_v61  ;;  %v3869_v61 = vld [vmem:[%s4124_s23 + $0x190] sm:$0xff]  }
  0xc2   : > { %3411 = vmatprep.mubr.msk.bf16.mxu1 %vm3980_vm0, %v3979_v0 }
  0xc3   : > { %3464 = vmatmul.mubr.bf16.gmra.mrb[40].mxu0 %v3815_v62 }
  0xc4   : > { %3467 = vmatprep.mubr.msk.bf16.mxu0 %vm3980_vm0, %v3979_v0 }
  0xc9   : > { %3412 = vmatmul.mubr.bf16.gmra.mrb[44].mxu1 %v3814_v63 }
  0xca   : > { %3415 = vmatprep.mubr.msk.bf16.mxu1 %vm3980_vm0, %v3979_v0 }
  0xcb   : > { %3468 = vmatmul.mubr.bf16.gmra.mrb[44].mxu0 %v3819_v1 }
  0xcc   : > { %3471 = vmatprep.mubr.msk.bf16.mxu0 %vm3980_vm0, %v3979_v0 }
  0xd1   : > { %3416 = vmatmul.mubr.bf16.gmra.mrb[48].mxu1 %v3818_v2 }
  0xd2   : > { %3419 = vmatprep.mubr.msk.bf16.mxu1 %vm3980_vm0, %v3979_v0 }
  0xd3   : > { %3472 = vmatmul.mubr.bf16.gmra.mrb[48].mxu0 %v3822_v3 }
  0xd4   : > { %3543 = vmatprep.mubr.msk.bf16.mxu0 %vm3980_vm0, %v3979_v0 }
  0xd9   : > { %3420 = vmatmul.mubr.bf16.gmra.mrb[52].mxu1 %v3821_v4  ;;  %v3872_v4 = vld [vmem:[%s4124_s23 + $0x1e0] sm:$0xff]  }
  0xda   : > { %3491 = vmatprep.mubr.msk.bf16.mxu1 %vm3980_vm0, %v3979_v0 }
  0xdb   : > { %3544 = vmatmul.mubr.bf16.vlgmr.msra.gmra.mrb[52].mxu0 %v3826_v5 }
  0xdc   : > { %3632 = vmatpush3.bf16.msra.mxu0 %v3828_v6  ;;  %3547 = vmatprep.mubr.msk.bf16.mxu0 %vm3980_vm0, %v3979_v0 }
  0xdd   : > { %3633 = vmatprep.subr.bf16.mxu0 %v3979_v0 }
  0xe0   : > { %3634 = vmatpush3.bf16.msra.mxu0 %v3832_v7 }
  0xe1   : > { %3492 = vmatmul.mubr.bf16.vlgmr.msra.gmra.mrb[56].mxu1 %v3825_v8  ;;  %3635 = vmatprep.subr.bf16.mxu0 %v3979_v0  ;;  %v3871_v8 = vld [vmem:[%s4124_s23 + $0x198] sm:$0xff]  }
  0xe2   : > { %3580 = vmatpush3.bf16.msra.mxu1 %v3827_v9  ;;  %3495 = vmatprep.mubr.msk.bf16.mxu1 %vm3980_vm0, %v3979_v0 }
  0xe3   : > { %3548 = vmatmul.mubr.bf16.gmra.mrb[56].mxu0 %v3830_v10  ;;  %3581 = vmatprep.subr.bf16.mxu1 %v3979_v0 }
  0xe4   : > { %3551 = vmatprep.mubr.msk.bf16.mxu0 %vm3980_vm0, %v3979_v0  ;;  %3636 = vmatpush3.bf16.msra.mxu0 %v3836_v11 }
  0xe5   : > { %3637 = vmatprep.subr.bf16.mxu0 %v3979_v0 }
  0xe6   : > { %3582 = vmatpush3.bf16.msra.mxu1 %v3831_v12 }
  0xe7   : > { %3583 = vmatprep.subr.bf16.mxu1 %v3979_v0 }
  0xe8   : > { %3638 = vmatpush3.bf16.msra.mxu0 %v3840_v13 }
  0xe9   : > { %3496 = vmatmul.mubr.bf16.gmra.mrb[60].mxu1 %v3829_v14  ;;  %3639 = vmatprep.subr.bf16.mxu0 %v3979_v0  ;;  %v3874_v14 = vld [vmem:[%s4124_s23 + $0x1e8] sm:$0xff]  }
  0xea   : > { %3499 = vmatprep.mubr.msk.bf16.mxu1 %vm3980_vm0, %v3979_v0  ;;  %3584 = vmatpush3.bf16.msra.mxu1 %v3835_v15 }
  0xeb   : > { %3552 = vmatmul.mubr.bf16.gmra.mrb[60].mxu0 %v3834_v16  ;;  %3585 = vmatprep.subr.bf16.mxu1 %v3979_v0 }
  0xec   : > { %3555 = vmatprep.mubr.msk.bf16.mxu0 %vm3980_vm0, %v3979_v0  ;;  %3640 = vmatpush3.bf16.msra.mxu0 %v3844_v17 }
  0xed   : > { %3641 = vmatprep.subr.bf16.mxu0 %v3979_v0 }
  0xee   : > { %3586 = vmatpush3.bf16.msra.mxu1 %v3839_v18  ;;  %v3873_v18 = vld [vmem:[%s4124_s23 + $0x1a0] sm:$0xff]  }
  0xef   : > { %3587 = vmatprep.subr.bf16.mxu1 %v3979_v0 }
  0xf0   : > { %3642 = vmatpush3.bf16.msra.mxu0 %v3850_v19 }
  0xf1   : > { %3500 = vmatmul.mubr.bf16.gmra.mrb[64].mxu1 %v3833_v20  ;;  %3643 = vmatprep.subr.bf16.mxu0 %v3979_v0 }
  0xf2   : > { %3503 = vmatprep.mubr.msk.bf16.mxu1 %vm3980_vm0, %v3979_v0  ;;  %3588 = vmatpush3.bf16.msra.mxu1 %v3843_v21 }
  0xf3   : > { %3556 = vmatmul.mubr.bf16.gmra.mrb[64].mxu0 %v3838_v22  ;;  %3589 = vmatprep.subr.bf16.mxu1 %v3979_v0 }
  0xf4   : > { %3559 = vmatprep.mubr.msk.bf16.mxu0 %vm3980_vm0, %v3979_v0  ;;  %3644 = vmatpush3.bf16.msra.mxu0 %v3854_v23 }
  0xf5   : > { %3645 = vmatprep.subr.bf16.mxu0 %v3979_v0 }
  0xf6   : > { %3590 = vmatpush3.bf16.msra.mxu1 %v3847_v24  ;;  %v3876_v24 = vld [vmem:[%s4124_s23 + $0x1f0] sm:$0xff]  }
  0xf7   : > { %3591 = vmatprep.subr.bf16.mxu1 %v3979_v0 }
  0xf8   : > { %3646 = vmatpush3.bf16.msra.mxu0 %v3858_v25 }
  0xf9   : > { %3504 = vmatmul.mubr.bf16.gmra.mrb[68].mxu1 %v3837_v26 }
  0xfa   : > { %3507 = vmatprep.mubr.msk.bf16.mxu1 %vm3980_vm0, %v3979_v0  ;;  %3592 = vmatpush3.bf16.msra.mxu1 %v3851_v27  ;;  %v3875_v27 = vld [vmem:[%s4124_s23 + $0x1a8] sm:$0xff]  }
  0xfb   : > { %3560 = vmatmul.mubr.bf16.gmra.mrb[68].mxu0 %v3842_v28  ;;  %3593 = vmatprep.subr.bf16.mxu1 %v3979_v0 }
  0xfc   : > { %3563 = vmatprep.mubr.msk.bf16.mxu0 %vm3980_vm0, %v3979_v0 }
  0xfe   : > { %3594 = vmatpush3.bf16.msra.mxu1 %v3857_v29 }
 0x101   : > { %3508 = vmatmul.mubr.bf16.gmra.mrb[72].mxu1 %v3841_v30 }
 0x102   : > { %3511 = vmatprep.mubr.msk.bf16.mxu1 %vm3980_vm0, %v3979_v0 }
 0x103   : > { %3564 = vmatmul.mubr.bf16.gmra.mrb[72].mxu0 %v3846_v31 }
 0x104   : > { %3567 = vmatprep.mubr.msk.bf16.mxu0 %vm3980_vm0, %v3979_v0 }
 0x109   : > { %3512 = vmatmul.mubr.bf16.gmra.mrb[76].mxu1 %v3845_v32 }
 0x10a   : > { %3515 = vmatprep.mubr.msk.bf16.mxu1 %vm3980_vm0, %v3979_v0 }
 0x10b   : > { %3568 = vmatmul.mubr.bf16.gmra.mrb[76].mxu0 %v3849_v33 }
 0x10c   : > { %3571 = vmatprep.mubr.msk.bf16.mxu0 %vm3980_vm0, %v3979_v0 }
 0x111   : > { %3516 = vmatmul.mubr.bf16.gmra.mrb[80].mxu1 %v3848_v34 }
 0x112   : > { %3519 = vmatprep.mubr.msk.bf16.mxu1 %vm3980_vm0, %v3979_v0 }
 0x113   : > { %3572 = vmatmul.mubr.bf16.gmra.mrb[80].mxu0 %v3853_v35 }
 0x114   : > { %3575 = vmatprep.mubr.msk.bf16.mxu0 %vm3980_vm0, %v3979_v0 }
 0x119   : > { %3520 = vmatmul.mubr.bf16.gmra.mrb[84].mxu1 %v3852_v36 }
 0x11a   : > { %3523 = vmatprep.mubr.msk.bf16.mxu1 %vm3980_vm0, %v3979_v0 }
 0x11b   : > { %3576 = vmatmul.mubr.bf16.gmra.mrb[84].mxu0 %v3856_v37 }
 0x11c   : > { %3647 = vmatprep.mubr.msk.bf16.mxu0 %vm3980_vm0, %v3979_v0 }
 0x121   : > { %3524 = vmatmul.mubr.bf16.gmra.mrb[88].mxu1 %v3855_v38 }
 0x122   : > { %3595 = vmatprep.mubr.msk.bf16.mxu1 %vm3980_vm0, %v3979_v0 }
 0x123   : > { %3648 = vmatmul.mubr.bf16.vlgmr.msra.gmra.mrb[88].mxu0 %v3860_v39 }
 0x124   : > { %3651 = vmatprep.mubr.msk.bf16.mxu0 %vm3980_vm0, %v3979_v0 }
 0x129   : > { %3596 = vmatmul.mubr.bf16.vlgmr.msra.gmra.mrb[92].mxu1 %v3859_v40 }
 0x12a   : > { %3599 = vmatprep.mubr.msk.bf16.mxu1 %vm3980_vm0, %v3979_v0 }
 0x12b   : > { %3652 = vmatmul.mubr.bf16.gmra.mrb[92].mxu0 %v3862_v41 }
 0x12c   : > { %3655 = vmatprep.mubr.msk.bf16.mxu0 %vm3980_vm0, %v3979_v0 }
 0x131   : > { %3600 = vmatmul.mubr.bf16.gmra.mrb[96].mxu1 %v3861_v42 }
 0x132   : > { %3603 = vmatprep.mubr.msk.bf16.mxu1 %vm3980_vm0, %v3979_v0 }
 0x133   : > { %3656 = vmatmul.mubr.bf16.gmra.mrb[96].mxu0 %v3864_v43 }
 0x134   : > { %3659 = vmatprep.mubr.msk.bf16.mxu0 %vm3980_vm0, %v3979_v0 }
 0x139   : > { %3604 = vmatmul.mubr.bf16.gmra.mrb[100].mxu1 %v3863_v44 }
 0x13a   : > { %3607 = vmatprep.mubr.msk.bf16.mxu1 %vm3980_vm0, %v3979_v0 }
 0x13b   : > { %3660 = vmatmul.mubr.bf16.gmra.mrb[100].mxu0 %v3866_v45 }
 0x13c   : > { %3663 = vmatprep.mubr.msk.bf16.mxu0 %vm3980_vm0, %v3979_v0 }
 0x141   : > { %3608 = vmatmul.mubr.bf16.gmra.mrb[104].mxu1 %v3865_v46 }
 0x142   : > { %3611 = vmatprep.mubr.msk.bf16.mxu1 %vm3980_vm0, %v3979_v0 }
 0x143   : > { %3664 = vmatmul.mubr.bf16.gmra.mrb[104].mxu0 %v3868_v47 }
 0x144   : > { %v4362_v48 = vpop.f32.mrb[0].mxu1  ;;  %v4364_v49 = vpop.f32.mrb[0].mxu0  ;;  %3667 = vmatprep.mubr.msk.bf16.mxu0 %vm3980_vm0, %v3979_v0 }
 0x145   : > { %v3353_v50 = vpop.f32.mrb[1].mxu1  ;;  %v3337_v52 = vpop.f32.mrb[1].mxu0 }
 0x146   : > { %v4369_v53 = vpop.f32.mrb[2].mxu1  ;;  %v4371_v54 = vpop.f32.mrb[2].mxu0 }
 0x147   : > { %v3354_v55 = vpop.f32.mrb[3].mxu1  ;;  %v3338_v56 = vpop.f32.mrb[3].mxu0 }
 0x149   : > { %3612 = vmatmul.mubr.bf16.gmra.mrb[108].mxu1 %v3867_v51 }
 0x14a   : > { %3615 = vmatprep.mubr.msk.bf16.mxu1 %vm3980_vm0, %v3979_v0 }
 0x14b   : > { %3668 = vmatmul.mubr.bf16.gmra.mrb[108].mxu0 %v3870_v57 }
 0x14c   : > { %v4376_v58 = vpop.f32.mrb[4].mxu1  ;;  %v4378_v59 = vpop.f32.mrb[4].mxu0  ;;  %3671 = vmatprep.mubr.msk.bf16.mxu0 %vm3980_vm0, %v3979_v0 }
 0x14d   : > { %v3357_v60 = vpop.f32.mrb[5].mxu1  ;;  %v3341_v62 = vpop.f32.mrb[5].mxu0 }
 0x14e   : > { %v4383_v63 = vpop.f32.mrb[6].mxu1  ;;  %v4385_v1 = vpop.f32.mrb[6].mxu0 }
 0x14f   : > { %v3358_v2 = vpop.f32.mrb[7].mxu1  ;;  %v3342_v3 = vpop.f32.mrb[7].mxu0 }
 0x151   : > { %3616 = vmatmul.mubr.bf16.gmra.mrb[112].mxu1 %v3869_v61 }
 0x152   : > { %3619 = vmatprep.mubr.msk.bf16.mxu1 %vm3980_vm0, %v3979_v0 }
 0x153   : > { %3672 = vmatmul.mubr.bf16.gmra.mrb[112].mxu0 %v3872_v4 }
 0x154   : > { %v4390_v5 = vpop.f32.mrb[8].mxu1  ;;  %v429_v6 = vpop.f32.mrb[8].mxu0  ;;  %3675 = vmatprep.mubr.msk.bf16.mxu0 %vm3980_vm0, %v3979_v0 }
 0x155   : > { %v3361_v7 = vpop.f32.mrb[9].mxu1  ;;  %v3345_v9 = vpop.f32.mrb[9].mxu0 }
 0x156   : > { %v4395_v10 = vpop.f32.mrb[10].mxu1  ;;  %v432_v11 = vpop.f32.mrb[10].mxu0 }
 0x157   : > { %v3362_v12 = vpop.f32.mrb[11].mxu1  ;;  %v3346_v13 = vpop.f32.mrb[11].mxu0 }
 0x159   : > { %3620 = vmatmul.mubr.bf16.gmra.mrb[116].mxu1 %v3871_v8 }
 0x15a   : > { %3623 = vmatprep.mubr.msk.bf16.mxu1 %vm3980_vm0, %v3979_v0 }
 0x15b   : > { %3676 = vmatmul.mubr.bf16.gmra.mrb[116].mxu0 %v3874_v14 }
 0x15c   : > { %v4400_v15 = vpop.f32.mrb[12].mxu1  ;;  %v437_v16 = vpop.f32.mrb[12].mxu0  ;;  %3679 = vmatprep.mubr.msk.bf16.mxu0 %vm3980_vm0, %v3979_v0 }
 0x15d   : > { %v3365_v17 = vpop.f32.mrb[13].mxu1  ;;  %v3349_v19 = vpop.f32.mrb[13].mxu0 }
 0x15e   : > { %v4405_v20 = vpop.f32.mrb[14].mxu1  ;;  %v440_v21 = vpop.f32.mrb[14].mxu0 }
 0x15f   : > { %v3366_v22 = vpop.f32.mrb[15].mxu1  ;;  %v3350_v23 = vpop.f32.mrb[15].mxu0 }
 0x161   : > { %3624 = vmatmul.mubr.bf16.gmra.mrb[120].mxu1 %v3873_v18 }
 0x162   : > { %3627 = vmatprep.mubr.msk.bf16.mxu1 %vm3980_vm0, %v3979_v0 }
 0x163   : > { %3680 = vmatmul.mubr.bf16.gmra.mrb[120].mxu0 %v3876_v24 }
 0x164   : > { %v4410_v25 = vpop.f32.mrb[16].mxu1 }
 0x165   : > { %v3369_v26 = vpop.f32.mrb[17].mxu1  ;;  %v863_v28 = vpop.f32.mrb[16].mxu0 }
 0x166   : > { %v4413_v29 = vpop.f32.mrb[18].mxu1  ;;  %v3441_v30 = vpop.f32.mrb[17].mxu0 }
 0x167   : > { %v3370_v31 = vpop.f32.mrb[19].mxu1  ;;  %v866_v32 = vpop.f32.mrb[18].mxu0 }
 0x168   : > { %v3442_v33 = vpop.f32.mrb[19].mxu0 }
 0x169   : > { %3628 = vmatmul.mubr.bf16.gmra.mrb[124].mxu1 %v3875_v27 }
 0x16c   : > { %v620_v34 = vpop.f32.mrb[20].mxu1 }
 0x16d   : > { %v621_v35 = vadd.f32 %v620_v34, %v4364_v49  ;;  %v3389_v36 = vpop.f32.mrb[21].mxu1 }
 0x16e   : > { %v623_v37 = vpop.f32.mrb[22].mxu1  ;;  %v871_v38 = vpop.f32.mrb[20].mxu0 }
 0x16f   : > { %v4416_v0 = vadd.f32 %v863_v28, %v621_v35  ;;  %v624_v39 = vadd.f32 %v623_v37, %v4371_v54  ;;  %v3390_v40 = vpop.f32.mrb[23].mxu1  ;;  %v3445_v41 = vpop.f32.mrb[21].mxu0 }
 0x170   : > { %v874_v42 = vpop.f32.mrb[22].mxu0 }
 0x171   : > { %v4419_v43 = vadd.f32 %v866_v32, %v624_v39  ;;  %v3446_v44 = vpop.f32.mrb[23].mxu0 }
 0x174   : > { %v628_v45 = vpop.f32.mrb[24].mxu1 }
 0x175   : > { %v629_v46 = vadd.f32 %v628_v45, %v4378_v59  ;;  %v3393_v47 = vpop.f32.mrb[25].mxu1 }
 0x176   : > { %v631_v50 = vpop.f32.mrb[26].mxu1  ;;  %v879_v51 = vpop.f32.mrb[24].mxu0 }
 0x177   : > { %v4422_v49 = vadd.f32 %v871_v38, %v629_v46  ;;  %v632_v52 = vadd.f32 %v631_v50, %v4385_v1  ;;  %v3394_v55 = vpop.f32.mrb[27].mxu1  ;;  %v3449_v56 = vpop.f32.mrb[25].mxu0 }
 0x178   : > { %v882_v57 = vpop.f32.mrb[26].mxu0 }
 0x179   : > { %v4425_v54 = vadd.f32 %v874_v42, %v632_v52  ;;  %v3450_v60 = vpop.f32.mrb[27].mxu0 }
 0x17c   : > { %v636_v61 = vpop.f32.mrb[28].mxu1 }
 0x17d   : > { %v637_v62 = vadd.f32 %v636_v61, %v429_v6  ;;  %v3397_v2 = vpop.f32.mrb[29].mxu1 }
 0x17e   : > { %v639_v3 = vpop.f32.mrb[30].mxu1  ;;  %v887_v4 = vpop.f32.mrb[28].mxu0 }
 0x17f   : > { %v4427_v7 = vadd.f32 %v879_v51, %v637_v62  ;;  %v640_v59 = vadd.f32 %v639_v3, %v432_v11  ;;  %v3398_v8 = vpop.f32.mrb[31].mxu1  ;;  %v3453_v9 = vpop.f32.mrb[29].mxu0 }
 0x180   : > { %v890_v12 = vpop.f32.mrb[30].mxu0 }
 0x181   : > { %v4429_v13 = vadd.f32 %v882_v57, %v640_v59  ;;  %v3454_v1 = vpop.f32.mrb[31].mxu0 }
 0x184   : > { %v644_v14 = vpop.f32.mrb[32].mxu1 }
 0x185   : > { %v645_v17 = vadd.f32 %v644_v14, %v437_v16  ;;  %v3401_v18 = vpop.f32.mrb[33].mxu1 }
 0x186   : > { %v647_v19 = vpop.f32.mrb[34].mxu1  ;;  %v895_v22 = vpop.f32.mrb[32].mxu0 }
 0x187   : > { %v4431_v23 = vadd.f32 %v887_v4, %v645_v17  ;;  %v648_v6 = vadd.f32 %v647_v19, %v440_v21  ;;  %v3402_v24 = vpop.f32.mrb[35].mxu1  ;;  %v3457_v26 = vpop.f32.mrb[33].mxu0 }
 0x188   : > { %v898_v27 = vpop.f32.mrb[34].mxu0 }
 0x189   : > { %v4433_v28 = vadd.f32 %v890_v12, %v648_v6  ;;  %v3458_v11 = vpop.f32.mrb[35].mxu0 }
 0x18c   : > { %v652_v30 = vpop.f32.mrb[36].mxu1 }
 0x18d   : > { %v653_v31 = vadd.f32 %v652_v30, %v4362_v48  ;;  %v3405_v32 = vpop.f32.mrb[37].mxu1 }
 0x18e   : > { %v655_v33 = vpop.f32.mrb[38].mxu1  ;;  %v903_v34 = vpop.f32.mrb[36].mxu0 }
 0x18f   : > { %v4436_v35 = vadd.f32 %v895_v22, %v653_v31  ;;  %v656_v16 = vadd.f32 %v655_v33, %v4369_v53  ;;  %v3406_v36 = vpop.f32.mrb[39].mxu1  ;;  %v3461_v37 = vpop.f32.mrb[37].mxu0 }
 0x190   : > { %v906_v38 = vpop.f32.mrb[38].mxu0 }
 0x191   : > { %v4439_v21 = vadd.f32 %v898_v27, %v656_v16  ;;  %v3462_v39 = vpop.f32.mrb[39].mxu0 }
 0x194   : > { %v660_v40 = vpop.f32.mrb[40].mxu1 }
 0x195   : > { %v661_v41 = vadd.f32 %v660_v40, %v4376_v58  ;;  %v3409_v42 = vpop.f32.mrb[41].mxu1 }
 0x196   : > { %v663_v44 = vpop.f32.mrb[42].mxu1  ;;  %v911_v45 = vpop.f32.mrb[40].mxu0 }
 0x197   : > { %v4442_v48 = vadd.f32 %v903_v34, %v661_v41  ;;  %v664_v46 = vadd.f32 %v663_v44, %v4383_v63  ;;  %v3410_v47 = vpop.f32.mrb[43].mxu1  ;;  %v3465_v50 = vpop.f32.mrb[41].mxu0 }
 0x198   : > { %v914_v51 = vpop.f32.mrb[42].mxu0 }
 0x199   : > { %v4445_v53 = vadd.f32 %v906_v38, %v664_v46  ;;  %v3466_v52 = vpop.f32.mrb[43].mxu0 }
 0x19c   : > { %v668_v55 = vpop.f32.mrb[44].mxu1 }
 0x19d   : > { %v669_v56 = vadd.f32 %v668_v55, %v4390_v5  ;;  %v3413_v57 = vpop.f32.mrb[45].mxu1 }
 0x19e   : > { %v671_v60 = vpop.f32.mrb[46].mxu1  ;;  %v919_v61 = vpop.f32.mrb[44].mxu0 }
 0x19f   : > { %v4448_v58 = vadd.f32 %v911_v45, %v669_v56  ;;  %v672_v62 = vadd.f32 %v671_v60, %v4395_v10  ;;  %v3414_v2 = vpop.f32.mrb[47].mxu1  ;;  %v3469_v3 = vpop.f32.mrb[45].mxu0 }
 0x1a0   : > { %v922_v4 = vpop.f32.mrb[46].mxu0 }
 0x1a1   : > { %v4451_v63 = vadd.f32 %v914_v51, %v672_v62  ;;  %v3470_v59 = vpop.f32.mrb[47].mxu0 }
 0x1a4   : > { %v676_v8 = vpop.f32.mrb[48].mxu1 }
 0x1a5   : > { %v677_v9 = vadd.f32 %v676_v8, %v4400_v15  ;;  %v3417_v12 = vpop.f32.mrb[49].mxu1 }
 0x1a6   : > { %v679_v1 = vpop.f32.mrb[50].mxu1  ;;  %v927_v14 = vpop.f32.mrb[48].mxu0 }
 0x1a7   : > { %v4454_v5 = vadd.f32 %v919_v61, %v677_v9  ;;  %v680_v17 = vadd.f32 %v679_v1, %v4405_v20  ;;  %v3418_v18 = vpop.f32.mrb[51].mxu1  ;;  %v3473_v19 = vpop.f32.mrb[49].mxu0 }
 0x1a8   : > { %v930_v22 = vpop.f32.mrb[50].mxu0 }
 0x1a9   : > { %v4457_v10 = vadd.f32 %v922_v4, %v680_v17  ;;  %v3474_v6 = vpop.f32.mrb[51].mxu0 }
 0x1ac   : > { %v684_v24 = vpop.f32.mrb[52].mxu1 }
 0x1ad   : > { %v685_v26 = vadd.f32 %v684_v24, %v4410_v25  ;;  %v3421_v27 = vpop.f32.mrb[53].mxu1 }
 0x1ae   : > { %v687_v11 = vpop.f32.mrb[54].mxu1  ;;  %v1385_v30 = vpop.f32.mrb[52].mxu0 }
 0x1af   : > { %v4460_v15 = vadd.f32 %v927_v14, %v685_v26  ;;  %v688_v31 = vadd.f32 %v687_v11, %v4413_v29  ;;  %v3422_v32 = vpop.f32.mrb[55].mxu1  ;;  %v3545_v33 = vpop.f32.mrb[53].mxu0 }
 0x1b0   : > { %v1388_v34 = vpop.f32.mrb[54].mxu0 }
 0x1b1   : > { %v4463_v20 = vadd.f32 %v930_v22, %v688_v31  ;;  %v3546_v16 = vpop.f32.mrb[55].mxu0 }
 0x1b4   : > { %v1124_v36 = vpop.f32.mrb[56].mxu1 }
 0x1b5   : > { %v1195_v37 = vadd.f32 %v1124_v36, %v4416_v0  ;;  %v3493_v38 = vpop.f32.mrb[57].mxu1 }
 0x1b6   : > { %v1127_v39 = vpop.f32.mrb[58].mxu1  ;;  %v1393_v40 = vpop.f32.mrb[56].mxu0 }
 0x1b7   : > { %v4466_v25 = vadd.f32 %v1385_v30, %v1195_v37  ;;  %v1196_v41 = vadd.f32 %v1127_v39, %v4419_v43  ;;  %v3494_v42 = vpop.f32.mrb[59].mxu1  ;;  %v3549_v44 = vpop.f32.mrb[57].mxu0 }
 0x1b8   : > { %v1396_v45 = vpop.f32.mrb[58].mxu0 }
 0x1b9   : > { %v4469_v29 = vadd.f32 %v1388_v34, %v1196_v41  ;;  %v3550_v46 = vpop.f32.mrb[59].mxu0 }
 0x1bc   : > { %v1132_v47 = vpop.f32.mrb[60].mxu1 }
 0x1bd   : > { %v1197_v50 = vadd.f32 %v1132_v47, %v4422_v49  ;;  %v3497_v51 = vpop.f32.mrb[61].mxu1 }
 0x1be   : > { %v1135_v52 = vpop.f32.mrb[62].mxu1  ;;  %v1401_v55 = vpop.f32.mrb[60].mxu0 }
 0x1bf   : > { %v4472_v0 = vadd.f32 %v1393_v40, %v1197_v50  ;;  %v1198_v56 = vadd.f32 %v1135_v52, %v4425_v54  ;;  %v3498_v57 = vpop.f32.mrb[63].mxu1  ;;  %v3553_v60 = vpop.f32.mrb[61].mxu0 }
 0x1c0   : > { %v1404_v61 = vpop.f32.mrb[62].mxu0 }
 0x1c1   : > { %v4475_v43 = vadd.f32 %v1396_v45, %v1198_v56  ;;  %v3554_v62 = vpop.f32.mrb[63].mxu0 }
 0x1c4   : > { %v1140_v2 = vpop.f32.mrb[64].mxu1 }
 0x1c5   : > { %v1199_v3 = vadd.f32 %v1140_v2, %v4427_v7  ;;  %v3501_v4 = vpop.f32.mrb[65].mxu1 }
 0x1c6   : > { %v1143_v59 = vpop.f32.mrb[66].mxu1  ;;  %v1409_v8 = vpop.f32.mrb[64].mxu0 }
 0x1c7   : > { %v4478_v49 = vadd.f32 %v1401_v55, %v1199_v3  ;;  %v1200_v9 = vadd.f32 %v1143_v59, %v4429_v13  ;;  %v3502_v12 = vpop.f32.mrb[67].mxu1  ;;  %v3557_v1 = vpop.f32.mrb[65].mxu0 }
 0x1c8   : > { %v1412_v14 = vpop.f32.mrb[66].mxu0 }
 0x1c9   : > { %v4481_v54 = vadd.f32 %v1404_v61, %v1200_v9  ;;  %v3558_v17 = vpop.f32.mrb[67].mxu0 }
 0x1cc   : > { %v1148_v18 = vpop.f32.mrb[68].mxu1 }
 0x1cd   : > { %v1201_v19 = vadd.f32 %v1148_v18, %v4431_v23  ;;  %v3505_v22 = vpop.f32.mrb[69].mxu1 }
 0x1ce   : > { %v1151_v6 = vpop.f32.mrb[70].mxu1  ;;  %v1417_v24 = vpop.f32.mrb[68].mxu0 }
 0x1cf   : > { %v4484_v7 = vadd.f32 %v1409_v8, %v1201_v19  ;;  %v1202_v26 = vadd.f32 %v1151_v6, %v4433_v28  ;;  %v3506_v27 = vpop.f32.mrb[71].mxu1  ;;  %v3561_v11 = vpop.f32.mrb[69].mxu0 }
 0x1d0   : > { %v1420_v30 = vpop.f32.mrb[70].mxu0 }
 0x1d1   : > { %v4487_v13 = vadd.f32 %v1412_v14, %v1202_v26  ;;  %v3562_v31 = vpop.f32.mrb[71].mxu0 }
 0x1d4   : > { %v1156_v32 = vpop.f32.mrb[72].mxu1 }
 0x1d5   : > { %v1203_v33 = vadd.f32 %v1156_v32, %v4436_v35  ;;  %v3509_v34 = vpop.f32.mrb[73].mxu1 }
 0x1d6   : > { %v1159_v16 = vpop.f32.mrb[74].mxu1  ;;  %v1425_v36 = vpop.f32.mrb[72].mxu0 }
 0x1d7   : > { %v4490_v23 = vadd.f32 %v1417_v24, %v1203_v33  ;;  %v1204_v37 = vadd.f32 %v1159_v16, %v4439_v21  ;;  %v3510_v38 = vpop.f32.mrb[75].mxu1  ;;  %v3565_v39 = vpop.f32.mrb[73].mxu0 }
 0x1d8   : > { %v1428_v40 = vpop.f32.mrb[74].mxu0 }
 0x1d9   : > { %v4493_v28 = vadd.f32 %v1420_v30, %v1204_v37  ;;  %v3566_v41 = vpop.f32.mrb[75].mxu0 }
 0x1dc   : > { %v1164_v42 = vpop.f32.mrb[76].mxu1 }
 0x1dd   : > { %v1205_v44 = vadd.f32 %v1164_v42, %v4442_v48  ;;  %v3513_v45 = vpop.f32.mrb[77].mxu1 }
 0x1de   : > { %v1167_v46 = vpop.f32.mrb[78].mxu1  ;;  %v1433_v47 = vpop.f32.mrb[76].mxu0 }
 0x1df   : > { %v4496_v35 = vadd.f32 %v1425_v36, %v1205_v44  ;;  %v1206_v50 = vadd.f32 %v1167_v46, %v4445_v53  ;;  %v3514_v51 = vpop.f32.mrb[79].mxu1  ;;  %v3569_v52 = vpop.f32.mrb[77].mxu0 }
 0x1e0   : > { %v1436_v55 = vpop.f32.mrb[78].mxu0  ;;  %v3981_v52 = vmov 1983009808  }
 0x1e1   : > { %v4499_v21 = vadd.f32 %v1428_v40, %v1206_v50  ;;  %v3570_v56 = vpop.f32.mrb[79].mxu0 }
 0x1e4   : > { %v1172_v57 = vpop.f32.mrb[80].mxu1 }
 0x1e5   : > { %v1207_v60 = vadd.f32 %v1172_v57, %v4448_v58  ;;  %v3517_v61 = vpop.f32.mrb[81].mxu1 }
 0x1e6   : > { %v1175_v62 = vpop.f32.mrb[82].mxu1  ;;  %v1441_v2 = vpop.f32.mrb[80].mxu0 }
 0x1e7   : > { %v4502_v48 = vadd.f32 %v1433_v47, %v1207_v60  ;;  %v1208_v3 = vadd.f32 %v1175_v62, %v4451_v63  ;;  %v3518_v4 = vpop.f32.mrb[83].mxu1  ;;  %v3573_v59 = vpop.f32.mrb[81].mxu0 }
 0x1e8   : > { %v1444_v8 = vpop.f32.mrb[82].mxu0 }
 0x1e9   : > { %v4505_v53 = vadd.f32 %v1436_v55, %v1208_v3  ;;  %v3574_v9 = vpop.f32.mrb[83].mxu0  ;;  %v2148_v55 = vunpack.c.l.s4 %v3981_v52 }
 0x1ec   : > { %v1180_v12 = vpop.f32.mrb[84].mxu1 }
 0x1ed   : > { %v1209_v1 = vadd.f32 %v1180_v12, %v4454_v5  ;;  %v3521_v14 = vpop.f32.mrb[85].mxu1 }
 0x1ee   : > { %v1183_v17 = vpop.f32.mrb[86].mxu1  ;;  %v1449_v18 = vpop.f32.mrb[84].mxu0 }
 0x1ef   : > { %v4508_v58 = vadd.f32 %v1441_v2, %v1209_v1  ;;  %v1210_v19 = vadd.f32 %v1183_v17, %v4457_v10  ;;  %v3522_v22 = vpop.f32.mrb[87].mxu1  ;;  %v3577_v6 = vpop.f32.mrb[85].mxu0  ;;  %v2149_v2 = vunpack.c.0.s8 %v2148_v55 }
 0x1f0   : > { %v1452_v24 = vpop.f32.mrb[86].mxu0 }
 0x1f1   : > { %v4511_v63 = vadd.f32 %v1444_v8, %v1210_v19  ;;  %v3578_v26 = vpop.f32.mrb[87].mxu0 }
 0x1f4   : > { %v1188_v27 = vpop.f32.mrb[88].mxu1 }
 0x1f5   : > { %v1211_v11 = vadd.f32 %v1188_v27, %v4460_v15  ;;  %v3525_v30 = vpop.f32.mrb[89].mxu1  ;;  %v4523_v15 = vld [vmem:[%s4778_s2] ss:$0 sm:$0xff] }
 0x1f6   : > { %v1191_v31 = vpop.f32.mrb[90].mxu1  ;;  %v1907_v32 = vpop.f32.mrb[88].mxu0 }
 0x1f7   : > { %v4514_v5 = vadd.f32 %v1449_v18, %v1211_v11  ;;  %v1212_v33 = vadd.f32 %v1191_v31, %v4463_v20  ;;  %v3526_v34 = vpop.f32.mrb[91].mxu1  ;;  %v3649_v16 = vpop.f32.mrb[89].mxu0 }
 0x1f8   : > { %v1910_v36 = vpop.f32.mrb[90].mxu0 }
 0x1f9   : > { %v4517_v10 = vadd.f32 %v1452_v24, %v1212_v33  ;;  %v3650_v37 = vpop.f32.mrb[91].mxu0 }
 0x1fc   : > { %v1646_v38 = vpop.f32.mrb[92].mxu1 }
 0x1fd   : > { %v1717_v39 = vadd.f32 %v1646_v38, %v4466_v25  ;;  %v3597_v40 = vpop.f32.mrb[93].mxu1  ;;  %v2150_v25 = vlaneseq }
 0x1fe   : > { %v1649_v41 = vpop.f32.mrb[94].mxu1  ;;  %v1915_v42 = vpop.f32.mrb[92].mxu0 }
 0x1ff   : > { %v1978_v44 = vadd.f32 %v1907_v32, %v1717_v39  ;;  %v1718_v20 = vadd.f32 %v1649_v41, %v4469_v29  ;;  %v3598_v45 = vpop.f32.mrb[95].mxu1  ;;  %v3653_v46 = vpop.f32.mrb[93].mxu0  ;;  %v2151_v3 = vshrl.u32 %v2150_v25, 7 }
 0x200   : > { %v1918_v47 = vpop.f32.mrb[94].mxu0 }
 0x201   : > { %v2003_v50 = vadd.f32 %v4523_v15, %v1978_v44  ;;  %v1979_v51 = vadd.f32 %v1910_v36, %v1718_v20  ;;  %v3654_v56 = vpop.f32.mrb[95].mxu0  ;;  %v4530_v6 = vsub.s32 %v2149_v2, %v2151_v3 }
 0x203   : > { %v2004_v57 = vadd.f32 %v4523_v15, %v1979_v51  ;;  %v2021_v60 = vmul.f32 0.01, %v2003_v50 }
 0x204   : > { %v1654_v61 = vpop.f32.mrb[96].mxu1 }
 0x205   : > { %v2022_v62 = vmul.f32 0.01, %v2004_v57  ;;  %v1719_v4 = vadd.f32 %v1654_v61, %v4472_v0  ;;  %v3601_v29 = vpop.f32.mrb[97].mxu1  ;;  %v2039_v18 = vmax.f32 %v2003_v50, %v2021_v60 }
 0x206   : > { %v1657_v59 = vpop.f32.mrb[98].mxu1  ;;  %v1923_v8 = vpop.f32.mrb[96].mxu0 }
 0x207   : > { %v2040_v9 = vmax.f32 %v2004_v57, %v2022_v62  ;;  %v1980_v12 = vadd.f32 %v1915_v42, %v1719_v4  ;;  %v1720_v1 = vadd.f32 %v1657_v59, %v4475_v43  ;;  %v3602_v14 = vpop.f32.mrb[99].mxu1  ;;  %v3657_v17 = vpop.f32.mrb[97].mxu0  ;;  %v2075_v31 = vcombine.high %v2039_v18, %v2039_v18 }
 0x208   : > { %v1926_v19 = vpop.f32.mrb[98].mxu0 }
 0x209   : > { %v2076_v22 = vcombine.high %v2040_v9, %v2040_v9  ;;  %v2005_v24 = vadd.f32 %v4523_v15, %v1980_v12  ;;  %v1981_v26 = vadd.f32 %v1918_v47, %v1720_v1  ;;  %v3658_v27 = vpop.f32.mrb[99].mxu0 }
 0x20b   : > { %v2111_v11 = vmax.f32 %v2039_v18, %v2076_v22  ;;  %v2023_v0 = vmul.f32 0.01, %v2005_v24  ;;  %v2006_v30 = vadd.f32 %v4523_v15, %v1981_v26 }
 0x20c   : > { %v1662_v32 = vpop.f32.mrb[100].mxu1 }
 0x20d   : > { %v2153_v43 = vrot.slane %v2111_v11, %v4530_v6  ;;  %v2041_v33 = vmax.f32 %v2005_v24, %v2023_v0  ;;  %v2024_v34 = vmul.f32 0.01, %v2006_v30  ;;  %v1721_v16 = vadd.f32 %v1662_v32, %v4478_v49  ;;  %v3605_v36 = vpop.f32.mrb[101].mxu1 }
 0x20e   : > { %v1665_v37 = vpop.f32.mrb[102].mxu1  ;;  %v4536_v38 = vpop.f32.mrb[100].mxu0 }
 0x20f   : > { %v2154_v39 = vcombine.high %v2153_v43, %v2153_v43  ;;  %v2328_v40 = vsel %vm2327_vm1, %v2153_v43, -inf  ;;  %v2077_v41 = vcombine.high %v2041_v33, %v2041_v33  ;;  %v2112_v42 = vmax.f32 %v2075_v31, %v2041_v33  ;;  %v3606_v44 = vpop.f32.mrb[103].mxu1  ;;  %v3661_v20 = vpop.f32.mrb[101].mxu0 }
 0x210   : > { %v2329_v45 = vrot.slane %v2328_v40, 4  ;;  %v4539_v46 = vmax.f32 %v2006_v30, %v2024_v34  ;;  %v1982_v47 = vadd.f32 %v1923_v8, %v1721_v16  ;;  %v1722_v50 = vadd.f32 %v1665_v37, %v4481_v54  ;;  %v4542_v51 = vpop.f32.mrb[102].mxu0 }
 0x211   : > { %v2335_v49 = vsel %vm2327_vm1, %v2154_v39, -inf  ;;  %v2113_v52 = vmax.f32 %v2040_v9, %v2077_v41  ;;  %v2161_v55 = vrot.slane %v2112_v42, %v4530_v6  ;;  %v3662_v25 = vpop.f32.mrb[103].mxu0 }
 0x212   : > { %v2330_v56 = vmax.f32 %v2328_v40, %v2329_v45  ;;  %v2336_v57 = vrot.slane %v2335_v49, 4  ;;  %v2078_v60 = vcombine.high %v4539_v46, %v4539_v46  ;;  %v2007_v61 = vadd.f32 %v4523_v15, %v1982_v47 }
 0x213   : > { %v2162_v62 = vcombine.high %v2161_v55, %v2161_v55  ;;  %v2169_v2 = vrot.slane %v2113_v52, %v4530_v6  ;;  %v2342_v54 = vsel %vm2327_vm1, %v2161_v55, -inf  ;;  %v1983_v3 = vadd.f32 %v1926_v19, %v1722_v50 }
 0x214   : > { %v2331_v4 = vrot.slane %v2330_v56, 2  ;;  %v2337_v29 = vmax.f32 %v2335_v49, %v2336_v57  ;;  %v2343_v59 = vrot.slane %v2342_v54, 4  ;;  %v2025_v8 = vmul.f32 0.01, %v2007_v61  ;;  %v4551_v9 = vpop.f32.mrb[104].mxu1 }
 0x215   : > { %v2170_v12 = vcombine.high %v2169_v2, %v2169_v2  ;;  %v2349_v1 = vsel %vm2327_vm1, %v2162_v62, -inf  ;;  %v2356_v14 = vsel %vm2327_vm1, %v2169_v2, -inf  ;;  %v2008_v17 = vadd.f32 %v4523_v15, %v1983_v3  ;;  %v3609_v18 = vpop.f32.mrb[105].mxu1 }
 0x216   : > { %v2332_v22 = vmax.f32 %v2330_v56, %v2331_v4  ;;  %v2338_v24 = vrot.slane %v2337_v29, 2  ;;  %v2344_v26 = vmax.f32 %v2342_v54, %v2343_v59  ;;  %v2350_v27 = vrot.slane %v2349_v1, 4  ;;  %v4556_v11 = vpop.f32.mrb[106].mxu1  ;;  %v4558_v19 = vpop.f32.mrb[104].mxu0 }
 0x217   : > { %v2357_v0 = vrot.slane %v2356_v14, 4  ;;  %v2363_v30 = vsel %vm2327_vm1, %v2170_v12, -inf  ;;  %v2043_v31 = vmax.f32 %v2007_v61, %v2025_v8  ;;  %v2026_v32 = vmul.f32 0.01, %v2008_v17  ;;  %v3610_v43 = vpop.f32.mrb[107].mxu1  ;;  %v3665_v33 = vpop.f32.mrb[105].mxu0 }
 0x218   : > { %v2333_v34 = vrot.slane %v2332_v22, 1  ;;  %v2339_v16 = vmax.f32 %v2337_v29, %v2338_v24  ;;  %v2345_v36 = vrot.slane %v2344_v26, 2  ;;  %v2351_v37 = vmax.f32 %v2349_v1, %v2350_v27  ;;  %v4561_v39 = vpop.f32.mrb[106].mxu0 }
 0x219   : > { %v2358_v40 = vmax.f32 %v2356_v14, %v2357_v0  ;;  %v2364_v41 = vrot.slane %v2363_v30, 4  ;;  %v2079_v42 = vcombine.high %v2043_v31, %v2043_v31  ;;  %v2044_v44 = vmax.f32 %v2008_v17, %v2026_v32  ;;  %v3666_v20 = vpop.f32.mrb[107].mxu0 }
 0x21a   : > { %v2334_v45 = vmax.f32 %v2332_v22, %v2333_v34  ;;  %v2340_v47 = vrot.slane %v2339_v16, 1  ;;  %v2346_v50 = vmax.f32 %v2344_v26, %v2345_v36  ;;  %v2352_v49 = vrot.slane %v2351_v37, 2 }
 0x21b   : > { %v2359_v52 = vrot.slane %v2358_v40, 2  ;;  %v2365_v55 = vmax.f32 %v2363_v30, %v2364_v41  ;;  %v2114_v25 = vmax.f32 %v4539_v46, %v2079_v42  ;;  %v2080_v56 = vcombine.high %v2044_v44, %v2044_v44 }
 0x21c   : > { %v2341_v57 = vmax.f32 %v2339_v16, %v2340_v47  ;;  %v3164_v61 = vpack.c.bf16 %v2334_v45, %v2334_v45  ;;  %v2347_v62 = vrot.slane %v2346_v50, 1  ;;  %v2353_v2 = vmax.f32 %v2351_v37, %v2352_v49  ;;  %v4564_v54 = vpop.f32.mrb[108].mxu1 }
 0x21d   : > { %v2360_v3 = vmax.f32 %v2358_v40, %v2359_v52  ;;  %v2366_v4 = vrot.slane %v2365_v55, 2  ;;  %v2177_v29 = vrot.slane %v2114_v25, %v4530_v6  ;;  %v2115_v59 = vmax.f32 %v2078_v60, %v2044_v44  ;;  %v3613_v8 = vpop.f32.mrb[109].mxu1 }
 0x21e   : > { %v3165_v12 = vpack.c.bf16 %v2341_v57, %v2341_v57  ;;  %v2724_v1 = vunpack.c.l.b16 %v3164_v61  ;;  %v2348_v14 = vmax.f32 %v2346_v50, %v2347_v62  ;;  %v2354_v17 = vrot.slane %v2353_v2, 1  ;;  %v4567_v46 = vpop.f32.mrb[110].mxu1  ;;  %v4569_v18 = vpop.f32.mrb[108].mxu0 }
 0x21f   : > { %v2361_v22 = vrot.slane %v2360_v3, 1  ;;  %v2367_v24 = vmax.f32 %v2365_v55, %v2366_v4  ;;  %v2178_v26 = vcombine.high %v2177_v29, %v2177_v29  ;;  %v2370_v27 = vsel %vm2327_vm1, %v2177_v29, -inf  ;;  %v3614_v0 = vpop.f32.mrb[111].mxu1  ;;  %v3669_v30 = vpop.f32.mrb[109].mxu0 }
 0x220   : > { %v2725_v32 = vunpack.c.l.b16 %v3165_v12  ;;  %v2355_v43 = vmax.f32 %v2353_v2, %v2354_v17  ;;  %v3166_v60 = vpack.c.bf16 %v2348_v14, %v2348_v14  ;;  %v2371_v33 = vrot.slane %v2370_v27, 4  ;;  %v4572_v34 = vpop.f32.mrb[110].mxu0 }
 0x221   : > { %v2362_v16 = vmax.f32 %v2360_v3, %v2361_v22  ;;  %v2368_v36 = vrot.slane %v2367_v24, 1  ;;  %v2377_v37 = vsel %vm2327_vm1, %v2178_v26, -inf  ;;  %v2116_v40 = vmax.f32 %v2043_v31, %v2080_v56  ;;  %v3670_v41 = vpop.f32.mrb[111].mxu0 }
 0x222   : > { %v2761_v42 = vsel %vm2760_vm2, %v2725_v32, %v2724_v1  ;;  %v3167_v44 = vpack.c.bf16 %v2355_v43, %v2355_v43  ;;  %v2726_v20 = vunpack.c.l.b16 %v3166_v60  ;;  %v2372_v45 = vmax.f32 %v2370_v27, %v2371_v33 }
 0x223   : > { %v2369_v47 = vmax.f32 %v2367_v24, %v2368_v36  ;;  %v3168_v50 = vpack.c.bf16 %v2362_v16, %v2362_v16  ;;  %v2378_v49 = vrot.slane %v2377_v37, 4  ;;  %v2185_v52 = vrot.slane %v2115_v59, %v4530_v6 }
 0x224   : > { %v2727_v55 = vunpack.c.l.b16 %v3167_v44  ;;  %v2763_v25 = vsel %vm2762_vm3, %v2726_v20, %v2761_v42  ;;  %v2373_v57 = vrot.slane %v2372_v45, 2  ;;  %v2193_v61 = vrot.slane %v2116_v40, %v4530_v6  ;;  %v4579_v62 = vpop.f32.mrb[112].mxu1 }
 0x225   : > { %v3169_v31 = vpack.c.bf16 %v2369_v47, %v2369_v47  ;;  %v2728_v56 = vunpack.c.l.b16 %v3168_v50  ;;  %v2379_v2 = vmax.f32 %v2377_v37, %v2378_v49  ;;  %v2186_v3 = vcombine.high %v2185_v52, %v2185_v52  ;;  %v3617_v4 = vpop.f32.mrb[113].mxu1 }
 0x226   : > { %v2765_v29 = vsel %vm2764_vm4, %v2727_v55, %v2763_v25  ;;  %v2374_v8 = vmax.f32 %v2372_v45, %v2373_v57  ;;  %v2194_v12 = vcombine.high %v2193_v61, %v2193_v61  ;;  %v2384_v59 = vsel %vm2327_vm1, %v2185_v52, -inf  ;;  %v4583_v1 = vpop.f32.mrb[114].mxu1  ;;  %v4585_v14 = vpop.f32.mrb[112].mxu0 }
 0x227   : > { %v2729_v17 = vunpack.c.l.b16 %v3169_v31  ;;  %v2767_v22 = vsel %vm2766_vm5, %v2728_v56, %v2765_v29  ;;  %v2380_v24 = vrot.slane %v2379_v2, 2  ;;  %v2385_v26 = vrot.slane %v2384_v59, 4  ;;  %v3618_v27 = vpop.f32.mrb[115].mxu1  ;;  %v3673_v0 = vpop.f32.mrb[113].mxu0 }
 0x228   : > { %v2375_v30 = vrot.slane %v2374_v8, 1  ;;  %v2391_v32 = vsel %vm2327_vm1, %v2186_v3, -inf  ;;  %v2398_v43 = vsel %vm2327_vm1, %v2193_v61, -inf  ;;  %v2405_v60 = vsel %vm2327_vm1, %v2194_v12, -inf  ;;  %v4592_v33 = vpop.f32.mrb[114].mxu0 }
 0x229   : > { %v2769_v16 = vsel %vm2768_vm6, %v2729_v17, %v2767_v22  ;;  %v2381_v36 = vmax.f32 %v2379_v2, %v2380_v24  ;;  %v2386_v37 = vmax.f32 %v2384_v59, %v2385_v26  ;;  %v2392_v40 = vrot.slane %v2391_v32, 4  ;;  %v3674_v41 = vpop.f32.mrb[115].mxu0 }
 0x22a   : > { %v2376_v42 = vmax.f32 %v2374_v8, %v2375_v30  ;;  %v2399_v44 = vrot.slane %v2398_v43, 4  ;;  %v2406_v20 = vrot.slane %v2405_v60, 4  ;;  %v1723_v45 = vadd.f32 %v4551_v9, %v4484_v7 }
 0x22b   : > { %v2382_v47 = vrot.slane %v2381_v36, 1  ;;  %v2387_v50 = vrot.slane %v2386_v37, 2  ;;  %v2393_v49 = vmax.f32 %v2391_v32, %v2392_v40  ;;  %v1724_v52 = vadd.f32 %v4556_v11, %v4487_v13 }
 0x22c   : > { %v3170_v55 = vpack.c.bf16 %v2376_v42, %v2376_v42  ;;  %v2400_v25 = vmax.f32 %v2398_v43, %v2399_v44  ;;  %v2407_v57 = vmax.f32 %v2405_v60, %v2406_v20  ;;  %v1984_v61 = vadd.f32 %v4536_v38, %v1723_v45  ;;  %v4605_v31 = vpop.f32.mrb[116].mxu1 }
 0x22d   : > { %v2383_v56 = vmax.f32 %v2381_v36, %v2382_v47  ;;  %v2388_v2 = vmax.f32 %v2386_v37, %v2387_v50  ;;  %v2394_v7 = vrot.slane %v2393_v49, 2  ;;  %v1985_v9 = vadd.f32 %v4542_v51, %v1724_v52  ;;  %v3621_v3 = vpop.f32.mrb[117].mxu1 }
 0x22e   : > { %v2730_v4 = vunpack.c.l.b16 %v3170_v55  ;;  %v2401_v29 = vrot.slane %v2400_v25, 2  ;;  %v2408_v8 = vrot.slane %v2407_v57, 2  ;;  %v2009_v12 = vadd.f32 %v4523_v15, %v1984_v61  ;;  %v4609_v13 = vpop.f32.mrb[118].mxu1  ;;  %v4611_v11 = vpop.f32.mrb[116].mxu0 }
 0x22f   : > { %v3171_v59 = vpack.c.bf16 %v2383_v56, %v2383_v56  ;;  %v2389_v38 = vrot.slane %v2388_v2, 1  ;;  %v2395_v17 = vmax.f32 %v2393_v49, %v2394_v7  ;;  %v2010_v22 = vadd.f32 %v4523_v15, %v1985_v9  ;;  %v3622_v24 = vpop.f32.mrb[119].mxu1  ;;  %v3677_v26 = vpop.f32.mrb[117].mxu0 }
 0x230   : > { %v2771_v51 = vsel %vm2770_vm7, %v2730_v4, %v2769_v16  ;;  %v2402_v27 = vmax.f32 %v2400_v25, %v2401_v29  ;;  %v2409_v0 = vmax.f32 %v2407_v57, %v2408_v8  ;;  %v2027_v30 = vmul.f32 0.01, %v2009_v12  ;;  %v4616_v32 = vpop.f32.mrb[118].mxu0 }
 0x231   : > { %v2731_v43 = vunpack.c.l.b16 %v3171_v59  ;;  %v2390_v60 = vmax.f32 %v2388_v2, %v2389_v38  ;;  %v2396_v36 = vrot.slane %v2395_v17, 1  ;;  %v2028_v37 = vmul.f32 0.01, %v2010_v22  ;;  %v3678_v40 = vpop.f32.mrb[119].mxu0 }
 0x232   : > { %v2403_v41 = vrot.slane %v2402_v27, 1  ;;  %v2410_v42 = vrot.slane %v2409_v0, 1  ;;  %v2045_v44 = vmax.f32 %v2009_v12, %v2027_v30  ;;  %v1725_v20 = vadd.f32 %v4564_v54, %v4490_v23 }
 0x233   : > { %v2773_v16 = vsel %vm2772_vm8, %v2731_v43, %v2771_v51  ;;  %v2397_v45 = vmax.f32 %v2395_v17, %v2396_v36  ;;  %v3172_v47 = vpack.c.bf16 %v2390_v60, %v2390_v60  ;;  %v2046_v50 = vmax.f32 %v2010_v22, %v2028_v37 }
 0x234   : > { %v2798_v49 = vpack.c.b16 %v2773_v16, %v2773_v16  ;;  %v2404_v52 = vmax.f32 %v2402_v27, %v2403_v41  ;;  %v2411_v55 = vmax.f32 %v2409_v0, %v2410_v42  ;;  %v2081_v25 = vcombine.high %v2045_v44, %v2045_v44  ;;  %v4626_v57 = vpop.f32.mrb[120].mxu1 }
 0x235   : > { %v3173_v61 = vpack.c.bf16 %v2397_v45, %v2397_v45  ;;  %v2732_v56 = vunpack.c.l.b16 %v3172_v47  ;;  %v2082_v23 = vcombine.high %v2046_v50, %v2046_v50  ;;  %v1986_v54 = vadd.f32 %v4558_v19, %v1725_v20  ;;  %v3625_v2 = vpop.f32.mrb[121].mxu1 }
 0x236   : > { %2808 = vst [vmem:[%s4623_s25] sm:$0xf] %v2798_v49  ;;  %v3174_v7 = vpack.c.bf16 %v2404_v52, %v2404_v52  ;;  %v3175_v9 = vpack.c.bf16 %v2411_v55, %v2411_v55  ;;  %v1726_v3 = vadd.f32 %v4567_v46, %v4493_v28  ;;  %v1727_v4 = vadd.f32 %v4579_v62, %v4496_v35  ;;  %v4634_v29 = vpop.f32.mrb[122].mxu1  ;;  %v4636_v8 = vpop.f32.mrb[120].mxu0 }
 0x237   : > { %v2733_v12 = vunpack.c.l.b16 %v3173_v61  ;;  %v2117_v59 = vmax.f32 %v2045_v44, %v2082_v23  ;;  %v2011_v38 = vadd.f32 %v4523_v15, %v1986_v54  ;;  %v1728_v19 = vadd.f32 %v4583_v1, %v4499_v21  ;;  %v3626_v17 = vpop.f32.mrb[123].mxu1  ;;  %v3681_v22 = vpop.f32.mrb[121].mxu0 }
 0x238   : > { %v2734_v24 = vunpack.c.l.b16 %v3174_v7  ;;  %v2735_v26 = vunpack.c.l.b16 %v3175_v9  ;;  %v1987_v28 = vadd.f32 %v4561_v39, %v1726_v3  ;;  %v1988_v46 = vadd.f32 %v4569_v18, %v1727_v4  ;;  %v4643_v35 = vpop.f32.mrb[122].mxu0 }
 0x239   : > { %v2774_v62 = vsel %vm2760_vm2, %v2733_v12, %v2732_v56  ;;  %v2201_v51 = vrot.slane %v2117_v59, %v4530_v6  ;;  %v2029_v27 = vmul.f32 0.01, %v2011_v38  ;;  %v1989_v0 = vadd.f32 %v4572_v34, %v1728_v19  ;;  %v3682_v30 = vpop.f32.mrb[123].mxu0 }
 0x23a   : > { %v2775_v21 = vsel %vm2762_vm3, %v2734_v24, %v2774_v62  ;;  %v2012_v1 = vadd.f32 %v4523_v15, %v1987_v28  ;;  %v2013_v43 = vadd.f32 %v4523_v15, %v1988_v46  ;;  %v1729_v39 = vadd.f32 %v4605_v31, %v4502_v48 }
 0x23b   : > { %v4654_v18 = vsel %vm2764_vm4, %v2735_v26, %v2775_v21  ;;  %v2202_v60 = vcombine.high %v2201_v51, %v2201_v51  ;;  %v2412_v36 = vsel %vm2327_vm1, %v2201_v51, -inf  ;;  %v2047_v37 = vmax.f32 %v2011_v38, %v2029_v27 }
 0x23c   : > { %v2413_v40 = vrot.slane %v2412_v36, 4  ;;  %v2030_v41 = vmul.f32 0.01, %v2012_v1  ;;  %v2031_v34 = vmul.f32 0.01, %v2013_v43  ;;  %v2014_v42 = vadd.f32 %v4523_v15, %v1989_v0  ;;  %v4658_v44 = vpop.f32.mrb[124].mxu1 }
 0x23d   : > { %v2419_v20 = vsel %vm2327_vm1, %v2202_v60, -inf  ;;  %v2083_v16 = vcombine.high %v2047_v37, %v2047_v37  ;;  %v2118_v45 = vmax.f32 %v2081_v25, %v2047_v37  ;;  %v1990_v48 = vadd.f32 %v4585_v14, %v1729_v39  ;;  %v3629_v31 = vpop.f32.mrb[125].mxu1 }
 0x23e   : > { %v2414_v47 = vmax.f32 %v2412_v36, %v2413_v40  ;;  %v2420_v49 = vrot.slane %v2419_v20, 4  ;;  %v2048_v52 = vmax.f32 %v2012_v1, %v2030_v41  ;;  %v4662_v55 = vmax.f32 %v2013_v43, %v2031_v34  ;;  %v4664_v61 = vpop.f32.mrb[126].mxu1 }
 0x23f   : > { %v2119_v56 = vmax.f32 %v2046_v50, %v2083_v16  ;;  %v2209_v23 = vrot.slane %v2118_v45, %v4530_v6  ;;  %v2032_v54 = vmul.f32 0.01, %v2014_v42  ;;  %v4668_v2 = vadd.f32 %v4523_v15, %v1990_v48  ;;  %v3630_v7 = vpop.f32.mrb[127].mxu1 }
 0x240   : > { %v2415_v9 = vrot.slane %v2414_v47, 2  ;;  %v2421_v25 = vmax.f32 %v2419_v20, %v2420_v49  ;;  %v2084_v3 = vcombine.high %v2048_v52, %v2048_v52  ;;  %v2085_v14 = vcombine.high %v4662_v55, %v4662_v55 }
 0x241   : > { %v2210_v4 = vcombine.high %v2209_v23, %v2209_v23  ;;  %v2217_v12 = vrot.slane %v2119_v56, %v4530_v6  ;;  %v2426_v59 = vsel %vm2327_vm1, %v2209_v23, -inf  ;;  %v2050_v38 = vmax.f32 %v2014_v42, %v2032_v54 }
 0x242   : > { %v2416_v50 = vmax.f32 %v2414_v47, %v2415_v9  ;;  %v2422_v19 = vrot.slane %v2421_v25, 2  ;;  %v2427_v17 = vrot.slane %v2426_v59, 4  ;;  %v2120_v22 = vmax.f32 %v2048_v52, %v2085_v14 }
 0x243   : > { %v2218_v24 = vcombine.high %v2217_v12, %v2217_v12  ;;  %v2433_v26 = vsel %vm2327_vm1, %v2210_v4, -inf  ;;  %v2440_v28 = vsel %vm2327_vm1, %v2217_v12, -inf  ;;  %v2086_v46 = vcombine.high %v2050_v38, %v2050_v38 }
 0x244   : > { %v2417_v62 = vrot.slane %v2416_v50, 1  ;;  %v2423_v51 = vmax.f32 %v2421_v25, %v2422_v19  ;;  %v2428_v27 = vmax.f32 %v2426_v59, %v2427_v17  ;;  %v2434_v0 = vrot.slane %v2433_v26, 4 }
 0x245   : > { %v2441_v30 = vrot.slane %v2440_v28, 4  ;;  %v2447_v21 = vsel %vm2327_vm1, %v2218_v24, -inf  ;;  %v2225_v1 = vrot.slane %v2120_v22, %v4530_v6  ;;  %v2121_v43 = vmax.f32 %v2084_v3, %v2050_v38 }
 0x246   : > { %v2418_v39 = vmax.f32 %v2416_v50, %v2417_v62  ;;  %v2424_v60 = vrot.slane %v2423_v51, 1  ;;  %v2429_v36 = vrot.slane %v2428_v27, 2  ;;  %v2435_v37 = vmax.f32 %v2433_v26, %v2434_v0 }
 0x247   : > { %v2442_v40 = vmax.f32 %v2440_v28, %v2441_v30  ;;  %v2448_v41 = vrot.slane %v2447_v21, 4  ;;  %v2226_v34 = vcombine.high %v2225_v1, %v2225_v1  ;;  %v2454_v42 = vsel %vm2327_vm1, %v2225_v1, -inf }
 0x248   : > { %v2425_v20 = vmax.f32 %v2423_v51, %v2424_v60  ;;  %v3176_v16 = vpack.c.bf16 %v2418_v39, %v2418_v39  ;;  %v2430_v45 = vmax.f32 %v2428_v27, %v2429_v36  ;;  %v2436_v48 = vrot.slane %v2435_v37, 2 }
 0x249   : > { %v2443_v31 = vrot.slane %v2442_v40, 2  ;;  %v2449_v47 = vmax.f32 %v2447_v21, %v2448_v41  ;;  %v2455_v49 = vrot.slane %v2454_v42, 4  ;;  %v2461_v52 = vsel %vm2327_vm1, %v2226_v34, -inf }
 0x24a   : > { %v3177_v56 = vpack.c.bf16 %v2425_v20, %v2425_v20  ;;  %v2736_v23 = vunpack.c.l.b16 %v3176_v16  ;;  %v2431_v54 = vrot.slane %v2430_v45, 1  ;;  %v2437_v7 = vmax.f32 %v2435_v37, %v2436_v48 }
 0x24b   : > { %v2444_v9 = vmax.f32 %v2442_v40, %v2443_v31  ;;  %v2450_v25 = vrot.slane %v2449_v47, 2  ;;  %v2456_v3 = vmax.f32 %v2454_v42, %v2455_v49  ;;  %v2462_v14 = vrot.slane %v2461_v52, 4 }
 0x24c   : > { %v2737_v4 = vunpack.c.l.b16 %v3177_v56  ;;  %v2777_v12 = vsel %vm2766_vm5, %v2736_v23, %v4654_v18  ;;  %v2432_v59 = vmax.f32 %v2430_v45, %v2431_v54  ;;  %v2438_v38 = vrot.slane %v2437_v7, 1 }
 0x24d   : > { %v2445_v50 = vrot.slane %v2444_v9, 1  ;;  %v2451_v19 = vmax.f32 %v2449_v47, %v2450_v25  ;;  %v2457_v17 = vrot.slane %v2456_v3, 2  ;;  %v2463_v22 = vmax.f32 %v2461_v52, %v2462_v14 }
 0x24e   : > { %v2439_v24 = vmax.f32 %v2437_v7, %v2438_v38  ;;  %v3178_v26 = vpack.c.bf16 %v2432_v59, %v2432_v59  ;;  %v2778_v28 = vsel %vm2768_vm6, %v2737_v4, %v2777_v12  ;;  %v2122_v62 = vmax.f32 %v4662_v55, %v2086_v46 }
 0x24f   : > { %v2446_v51 = vmax.f32 %v2444_v9, %v2445_v50  ;;  %v2452_v27 = vrot.slane %v2451_v19, 1  ;;  %v2458_v0 = vmax.f32 %v2456_v3, %v2457_v17  ;;  %v2464_v30 = vrot.slane %v2463_v22, 2 }
 0x250   : > { %v3179_v21 = vpack.c.bf16 %v2439_v24, %v2439_v24  ;;  %v2738_v1 = vunpack.c.l.b16 %v3178_v26  ;;  %v2233_v18 = vrot.slane %v2121_v43, %v4530_v6  ;;  %v2241_v39 = vrot.slane %v2122_v62, %v4530_v6 }
 0x251   : > { %v2453_v60 = vmax.f32 %v2451_v19, %v2452_v27  ;;  %v3180_v36 = vpack.c.bf16 %v2446_v51, %v2446_v51  ;;  %v2459_v37 = vrot.slane %v2458_v0, 1  ;;  %v2465_v40 = vmax.f32 %v2463_v22, %v2464_v30 }
 0x252   : > { %v2739_v41 = vunpack.c.l.b16 %v3179_v21  ;;  %v2779_v34 = vsel %vm2770_vm7, %v2738_v1, %v2778_v28  ;;  %v2234_v42 = vcombine.high %v2233_v18, %v2233_v18  ;;  %v2242_v20 = vcombine.high %v2241_v39, %v2241_v39 }
 0x253   : > { %v3181_v55 = vpack.c.bf16 %v2453_v60, %v2453_v60  ;;  %v2740_v46 = vunpack.c.l.b16 %v3180_v36  ;;  %v2460_v16 = vmax.f32 %v2458_v0, %v2459_v37  ;;  %v2466_v45 = vrot.slane %v2465_v40, 1 }
 0x254   : > { %v2780_v48 = vsel %vm2772_vm8, %v2739_v41, %v2779_v34  ;;  %v2468_v43 = vsel %vm2327_vm1, %v2233_v18, -inf  ;;  %v2475_v31 = vsel %vm2327_vm1, %v2234_v42, -inf  ;;  %v2482_v47 = vsel %vm2327_vm1, %v2241_v39, -inf }
 0x255   : > { %v2741_v49 = vunpack.c.l.b16 %v3181_v55  ;;  %v2799_v52 = vpack.c.b16 %v2780_v48, %v2780_v48  ;;  %v2467_v56 = vmax.f32 %v2465_v40, %v2466_v45  ;;  %v3182_v23 = vpack.c.bf16 %v2460_v16, %v2460_v16 }
 0x256   : > { %v2469_v54 = vrot.slane %v2468_v43, 4  ;;  %v2476_v7 = vrot.slane %v2475_v31, 4  ;;  %v2483_v9 = vrot.slane %v2482_v47, 4  ;;  %v2489_v25 = vsel %vm2327_vm1, %v2242_v20, -inf }
 0x257   : > { %v2781_v3 = vsel %vm2760_vm2, %v2741_v49, %v2740_v46  ;;  %2809 = vst [vmem:[%s4623_s25 + $0x4] sm:$0xf] %v2799_v52  ;;  %v3183_v14 = vpack.c.bf16 %v2467_v56, %v2467_v56  ;;  %v2742_v4 = vunpack.c.l.b16 %v3182_v23  ;;  %v2490_v12 = vrot.slane %v2489_v25, 4 }
 0x258   : > { %v2470_v59 = vmax.f32 %v2468_v43, %v2469_v54  ;;  %v2477_v38 = vmax.f32 %v2475_v31, %v2476_v7  ;;  %v2484_v50 = vmax.f32 %v2482_v47, %v2483_v9  ;;  %v2033_v19 = vmul.f32 0.01, %v4668_v2 }
 0x259   : > { %v2743_v17 = vunpack.c.l.b16 %v3183_v14  ;;  %v2782_v22 = vsel %vm2762_vm3, %v2742_v4, %v2781_v3  ;;  %v2491_v24 = vmax.f32 %v2489_v25, %v2490_v12  ;;  %v1730_v26 = vadd.f32 %v4609_v13, %v4505_v53 }
 0x25a   : > { %v2471_v28 = vrot.slane %v2470_v59, 2  ;;  %v2478_v62 = vrot.slane %v2477_v38, 2  ;;  %v2485_v51 = vrot.slane %v2484_v50, 2  ;;  %v1731_v21 = vadd.f32 %v4626_v57, %v4508_v58 }
 0x25b   : > { %v2492_v27 = vrot.slane %v2491_v24, 2  ;;  %v2783_v0 = vsel %vm2764_vm4, %v2743_v17, %v2782_v22  ;;  %v1991_v30 = vadd.f32 %v4592_v33, %v1730_v26  ;;  %v2051_v60 = vmax.f32 %v4668_v2, %v2033_v19 }
 0x25c   : > { %v2472_v1 = vmax.f32 %v2470_v59, %v2471_v28  ;;  %v2479_v18 = vmax.f32 %v2477_v38, %v2478_v62  ;;  %v2486_v39 = vmax.f32 %v2484_v50, %v2485_v51  ;;  %v1992_v53 = vadd.f32 %v4611_v11, %v1731_v21 }
 0x25d   : > { %v2493_v36 = vmax.f32 %v2491_v24, %v2492_v27  ;;  %v2016_v37 = vadd.f32 %v4523_v15, %v1991_v30  ;;  %v1732_v13 = vadd.f32 %v4634_v29, %v4511_v63  ;;  %v1733_v33 = vadd.f32 %v4658_v44, %v4514_v5 }
 0x25e   : > { %v2473_v40 = vrot.slane %v2472_v1, 1  ;;  %v2480_v41 = vrot.slane %v2479_v18, 1  ;;  %v2487_v34 = vrot.slane %v2486_v39, 1  ;;  %v2017_v42 = vadd.f32 %v4523_v15, %v1992_v53 }
 0x25f   : > { %v2494_v58 = vrot.slane %v2493_v36, 1  ;;  %v2034_v57 = vmul.f32 0.01, %v2016_v37  ;;  %v1993_v2 = vadd.f32 %v4616_v32, %v1732_v13  ;;  %v1994_v11 = vadd.f32 %v4636_v8, %v1733_v33 }
 0x260   : > { %v2474_v20 = vmax.f32 %v2472_v1, %v2473_v40  ;;  %v2481_v55 = vmax.f32 %v2479_v18, %v2480_v41  ;;  %v2488_v46 = vmax.f32 %v2486_v39, %v2487_v34  ;;  %v2035_v63 = vmul.f32 0.01, %v2017_v42 }
 0x261   : > { %v2495_v16 = vmax.f32 %v2493_v36, %v2494_v58  ;;  %v2052_v45 = vmax.f32 %v2016_v37, %v2034_v57  ;;  %v2018_v29 = vadd.f32 %v4523_v15, %v1993_v2  ;;  %v2019_v5 = vadd.f32 %v4523_v15, %v1994_v11 }
 0x262   : > { %v3184_v48 = vpack.c.bf16 %v2474_v20, %v2474_v20  ;;  %v3185_v43 = vpack.c.bf16 %v2481_v55, %v2481_v55  ;;  %v3186_v31 = vpack.c.bf16 %v2488_v46, %v2488_v46  ;;  %v2087_v47 = vcombine.high %v2051_v60, %v2051_v60 }
 0x263   : > { %v3187_v44 = vpack.c.bf16 %v2495_v16, %v2495_v16  ;;  %v2088_v49 = vcombine.high %v2052_v45, %v2052_v45  ;;  %v2053_v52 = vmax.f32 %v2017_v42, %v2035_v63  ;;  %v2036_v23 = vmul.f32 0.01, %v2018_v29 }
 0x264   : > { %v2744_v32 = vunpack.c.l.b16 %v3184_v48  ;;  %v2745_v56 = vunpack.c.l.b16 %v3185_v43  ;;  %v2037_v54 = vmul.f32 0.01, %v2019_v5  ;;  %v2746_v7 = vunpack.c.l.b16 %v3186_v31 }
 0x265   : > { %v2123_v8 = vmax.f32 %v2051_v60, %v2088_v49  ;;  %v2089_v9 = vcombine.high %v2053_v52, %v2053_v52  ;;  %v2124_v25 = vmax.f32 %v2087_v47, %v2053_v52  ;;  %v2747_v3 = vunpack.c.l.b16 %v3187_v44 }
 0x266   : > { %v2784_v14 = vsel %vm2766_vm5, %v2744_v32, %v2783_v0  ;;  %v4715_v4 = vmax.f32 %v2019_v5, %v2037_v54  ;;  %v1734_v12 = vadd.f32 %v4664_v61, %v4517_v10  ;;  %v4723_v22 = vmax.f32 %v2018_v29, %v2036_v23 }
 0x267   : > { %v2785_v59 = vsel %vm2768_vm6, %v2745_v56, %v2784_v14  ;;  %v2249_v38 = vrot.slane %v2123_v8, %v4530_v6  ;;  %v2125_v50 = vmax.f32 %v2052_v45, %v2089_v9  ;;  %v2257_v19 = vrot.slane %v2124_v25, %v4530_v6 }
 0x268   : > { %v2786_v17 = vsel %vm2770_vm7, %v2746_v7, %v2785_v59  ;;  %v2091_v24 = vcombine.high %v4715_v4, %v4715_v4  ;;  %v1995_v26 = vadd.f32 %v4643_v35, %v1734_v12 }
 0x269   : > { %v2787_v28 = vsel %vm2772_vm8, %v2747_v3, %v2786_v17  ;;  %v2250_v10 = vcombine.high %v2249_v38, %v2249_v38  ;;  %v2496_v61 = vsel %vm2327_vm1, %v2249_v38, -inf  ;;  %v2258_v62 = vcombine.high %v2257_v19, %v2257_v19 }
 0x26a   : > { %v2800_v51 = vpack.c.b16 %v2787_v28, %v2787_v28  ;;  %v2497_v27 = vrot.slane %v2496_v61, 4  ;;  %v2265_v0 = vrot.slane %v2125_v50, %v4530_v6  ;;  %v2510_v30 = vsel %vm2327_vm1, %v2257_v19, -inf }
 0x26b   : > { %v2503_v21 = vsel %vm2327_vm1, %v2250_v10, -inf  ;;  %v2511_v1 = vrot.slane %v2510_v30, 4  ;;  %v2517_v18 = vsel %vm2327_vm1, %v2258_v62, -inf  ;;  %v2126_v39 = vmax.f32 %v4723_v22, %v2091_v24 }
 0x26c   : > { %2810 = vst [vmem:[%s4623_s25 + $0x8] sm:$0xf] %v2800_v51  ;;  %v2498_v35 = vmax.f32 %v2496_v61, %v2497_v27  ;;  %v2504_v60 = vrot.slane %v2503_v21, 4  ;;  %v2266_v36 = vcombine.high %v2265_v0, %v2265_v0  ;;  %v2518_v37 = vrot.slane %v2517_v18, 4 }
 0x26d   : > { %v2512_v53 = vmax.f32 %v2510_v30, %v2511_v1  ;;  %v2524_v13 = vsel %vm2327_vm1, %v2265_v0, -inf  ;;  %v2273_v40 = vrot.slane %v2126_v39, %v4530_v6  ;;  %v2020_v41 = vadd.f32 %v4523_v15, %v1995_v26 }
 0x26e   : > { %v2499_v34 = vrot.slane %v2498_v35, 2  ;;  %v2505_v33 = vmax.f32 %v2503_v21, %v2504_v60  ;;  %v2519_v58 = vmax.f32 %v2517_v18, %v2518_v37  ;;  %v2525_v57 = vrot.slane %v2524_v13, 4 }
 0x26f   : > { %v2513_v42 = vrot.slane %v2512_v53, 2  ;;  %v2531_v2 = vsel %vm2327_vm1, %v2266_v36, -inf  ;;  %v2274_v20 = vcombine.high %v2273_v40, %v2273_v40  ;;  %v2538_v55 = vsel %vm2327_vm1, %v2273_v40, -inf }
 0x270   : > { %v2500_v46 = vmax.f32 %v2498_v35, %v2499_v34  ;;  %v2506_v11 = vrot.slane %v2505_v33, 2  ;;  %v2520_v16 = vrot.slane %v2519_v58, 2  ;;  %v2526_v45 = vmax.f32 %v2524_v13, %v2525_v57 }
 0x271   : > { %v2514_v63 = vmax.f32 %v2512_v53, %v2513_v42  ;;  %v2532_v29 = vrot.slane %v2531_v2, 4  ;;  %v2539_v48 = vrot.slane %v2538_v55, 4  ;;  %v2545_v43 = vsel %vm2327_vm1, %v2274_v20, -inf }
 0x272   : > { %v2501_v15 = vrot.slane %v2500_v46, 1  ;;  %v2507_v31 = vmax.f32 %v2505_v33, %v2506_v11  ;;  %v2521_v5 = vmax.f32 %v2519_v58, %v2520_v16  ;;  %v2527_v44 = vrot.slane %v2526_v45, 2 }
 0x273   : > { %v2515_v47 = vrot.slane %v2514_v63, 1  ;;  %v2533_v49 = vmax.f32 %v2531_v2, %v2532_v29  ;;  %v2540_v52 = vmax.f32 %v2538_v55, %v2539_v48  ;;  %v2546_v32 = vrot.slane %v2545_v43, 4 }
 0x274   : > { %v2502_v56 = vmax.f32 %v2500_v46, %v2501_v15  ;;  %v2508_v23 = vrot.slane %v2507_v31, 1  ;;  %v2522_v54 = vrot.slane %v2521_v5, 1  ;;  %v2528_v7 = vmax.f32 %v2526_v45, %v2527_v44 }
 0x275   : > { %v2516_v8 = vmax.f32 %v2514_v63, %v2515_v47  ;;  %v2534_v9 = vrot.slane %v2533_v49, 2  ;;  %v2541_v25 = vrot.slane %v2540_v52, 2  ;;  %v2547_v3 = vmax.f32 %v2545_v43, %v2546_v32 }
 0x276   : > { %v2509_v14 = vmax.f32 %v2507_v31, %v2508_v23  ;;  %v3188_v12 = vpack.c.bf16 %v2502_v56, %v2502_v56  ;;  %v2523_v59 = vmax.f32 %v2521_v5, %v2522_v54  ;;  %v2529_v38 = vrot.slane %v2528_v7, 1 }
 0x277   : > { %v2535_v50 = vmax.f32 %v2533_v49, %v2534_v9  ;;  %v3190_v19 = vpack.c.bf16 %v2516_v8, %v2516_v8  ;;  %v2542_v17 = vmax.f32 %v2540_v52, %v2541_v25  ;;  %v2548_v24 = vrot.slane %v2547_v3, 2 }
 0x278   : > { %v3189_v26 = vpack.c.bf16 %v2509_v14, %v2509_v14  ;;  %v2748_v28 = vunpack.c.l.b16 %v3188_v12  ;;  %v2530_v10 = vmax.f32 %v2528_v7, %v2529_v38  ;;  %v3191_v61 = vpack.c.bf16 %v2523_v59, %v2523_v59 }
 0x279   : > { %v2536_v62 = vrot.slane %v2535_v50, 1  ;;  %v2750_v51 = vunpack.c.l.b16 %v3190_v19  ;;  %v2543_v27 = vrot.slane %v2542_v17, 1  ;;  %v2549_v0 = vmax.f32 %v2547_v3, %v2548_v24 }
 0x27a   : > { %v2749_v30 = vunpack.c.l.b16 %v3189_v26  ;;  %v3192_v21 = vpack.c.bf16 %v2530_v10, %v2530_v10  ;;  %v2751_v1 = vunpack.c.l.b16 %v3191_v61  ;;  %v2038_v18 = vmul.f32 0.01, %v2020_v41 }
 0x27b   : > { %v2537_v39 = vmax.f32 %v2535_v50, %v2536_v62  ;;  %v2544_v35 = vmax.f32 %v2542_v17, %v2543_v27  ;;  %v2550_v60 = vrot.slane %v2549_v0, 1  ;;  %v2090_v53 = vcombine.high %v4723_v22, %v4723_v22 }
 0x27c   : > { %v2788_v36 = vsel %vm2760_vm2, %v2749_v30, %v2748_v28  ;;  %v2752_v37 = vunpack.c.l.b16 %v3192_v21  ;;  %v2056_v13 = vmax.f32 %v2020_v41, %v2038_v18 }
 0x27d   : > { %v3193_v40 = vpack.c.bf16 %v2537_v39, %v2537_v39  ;;  %v2789_v34 = vsel %vm2762_vm3, %v2750_v51, %v2788_v36  ;;  %v2551_v33 = vmax.f32 %v2549_v0, %v2550_v60  ;;  %v3194_v58 = vpack.c.bf16 %v2544_v35, %v2544_v35 }
 0x27e   : > { %v2790_v57 = vsel %vm2764_vm4, %v2751_v1, %v2789_v34  ;;  %v2092_v42 = vcombine.high %v2056_v13, %v2056_v13  ;;  %v2127_v2 = vmax.f32 %v2090_v53, %v2056_v13 }
 0x27f   : > { %v2753_v20 = vunpack.c.l.b16 %v3193_v40  ;;  %v2791_v55 = vsel %vm2766_vm5, %v2752_v37, %v2790_v57  ;;  %v3195_v46 = vpack.c.bf16 %v2551_v33, %v2551_v33  ;;  %v2754_v11 = vunpack.c.l.b16 %v3194_v58 }
 0x280   : > { %v2128_v16 = vmax.f32 %v4715_v4, %v2092_v42  ;;  %v2281_v45 = vrot.slane %v2127_v2, %v4530_v6 }
 0x281   : > { %v2792_v22 = vsel %vm2768_vm6, %v2753_v20, %v2791_v55  ;;  %v2755_v41 = vunpack.c.l.b16 %v3195_v46 }
 0x282   : > { %v2793_v63 = vsel %vm2770_vm7, %v2754_v11, %v2792_v22  ;;  %v2282_v29 = vcombine.high %v2281_v45, %v2281_v45  ;;  %v2289_v48 = vrot.slane %v2128_v16, %v4530_v6  ;;  %v2552_v43 = vsel %vm2327_vm1, %v2281_v45, -inf }
 0x283   : > { %v2794_v15 = vsel %vm2772_vm8, %v2755_v41, %v2793_v63  ;;  %v2553_v31 = vrot.slane %v2552_v43, 4 }
 0x284   : > { %v2801_v5 = vpack.c.b16 %v2794_v15, %v2794_v15  ;;  %v2290_v44 = vcombine.high %v2289_v48, %v2289_v48  ;;  %v2559_v4 = vsel %vm2327_vm1, %v2282_v29, -inf  ;;  %v2566_v47 = vsel %vm2327_vm1, %v2289_v48, -inf }
 0x285   : > { %v2554_v49 = vmax.f32 %v2552_v43, %v2553_v31  ;;  %v2560_v52 = vrot.slane %v2559_v4, 4  ;;  %v2567_v32 = vrot.slane %v2566_v47, 4 }
 0x286   : > { %2811 = vst [vmem:[%s4623_s25 + $0xc] sm:$0xf] %v2801_v5  ;;  %v2573_v56 = vsel %vm2327_vm1, %v2290_v44, -inf }
 0x287   : > { %v2555_v23 = vrot.slane %v2554_v49, 2  ;;  %v2561_v54 = vmax.f32 %v2559_v4, %v2560_v52  ;;  %v2568_v6 = vmax.f32 %v2566_v47, %v2567_v32  ;;  %v2574_v7 = vrot.slane %v2573_v56, 4 }
 0x289   : > { %v2556_v8 = vmax.f32 %v2554_v49, %v2555_v23  ;;  %v2562_v9 = vrot.slane %v2561_v54, 2  ;;  %v2569_v25 = vrot.slane %v2568_v6, 2  ;;  %v2575_v3 = vmax.f32 %v2573_v56, %v2574_v7 }
 0x28b   : > { %v2557_v14 = vrot.slane %v2556_v8, 1  ;;  %v2563_v12 = vmax.f32 %v2561_v54, %v2562_v9  ;;  %v2570_v59 = vmax.f32 %v2568_v6, %v2569_v25  ;;  %v2576_v38 = vrot.slane %v2575_v3, 2 }
 0x28d   : > { %v2558_v50 = vmax.f32 %v2556_v8, %v2557_v14  ;;  %v2564_v19 = vrot.slane %v2563_v12, 1  ;;  %v2571_v17 = vrot.slane %v2570_v59, 1  ;;  %v2577_v24 = vmax.f32 %v2575_v3, %v2576_v38 }
 0x28f   : > { %v2565_v26 = vmax.f32 %v2563_v12, %v2564_v19  ;;  %v2572_v28 = vmax.f32 %v2570_v59, %v2571_v17  ;;  %v2578_v10 = vrot.slane %v2577_v24, 1  ;;  %v3196_v61 = vpack.c.bf16 %v2558_v50, %v2558_v50 }
 0x291   : > { %v2579_v62 = vmax.f32 %v2577_v24, %v2578_v10  ;;  %v3197_v51 = vpack.c.bf16 %v2565_v26, %v2565_v26  ;;  %v3198_v27 = vpack.c.bf16 %v2572_v28, %v2572_v28  ;;  %v2756_v30 = vunpack.c.l.b16 %v3196_v61 }
 0x293   : > { %v3199_v0 = vpack.c.bf16 %v2579_v62, %v2579_v62  ;;  %v2757_v21 = vunpack.c.l.b16 %v3197_v51  ;;  %v2758_v1 = vunpack.c.l.b16 %v3198_v27 }
 0x295   : > { %v2759_v18 = vunpack.c.l.b16 %v3199_v0  ;;  %v2795_v39 = vsel %vm2760_vm2, %v2757_v21, %v2756_v30 }
 0x296   : > { %v2796_v35 = vsel %vm2762_vm3, %v2758_v1, %v2795_v39 }
 0x297   : > { %v2797_v60 = vsel %vm2764_vm4, %v2759_v18, %v2796_v35 }
 0x298   : > { %v2802_v36 = vpack.c.b16 %v2797_v60, %v2797_v60 }
 0x29a   : > { %2812 = vst [vmem:[%s4623_s25 + $0x10] sm:$0x3] %v2802_v36 }
 0x29b PF: > { %p14_p1 = scmp.ge.s32.totalorder %s4046_s22, 4   ;;  %s4791_s12 = smov %s3965_s13 }
 0x29c   : > { %s4792_s13 = smov %s3969_s14  ;;  %s4793_s14 = smov %s4075_s10 }
 0x29d   : > { %s4794_s15 = smov %s4046_s22  ;;  %16 = sbr.rel (!%p14_p1) target bundleno = 4 (0x4), region = 88 }
 0x2a4   :  { %2834 = vsyncpa [#allocation3], 1 }
 0x2a5   :  { %2836 = vsyncpa [#allocation3 + $0x1], 1 }
 0x2a6   :  { %2837 = vsyncpa [#allocation5], 1 }

</bundles_post_ra>
